<compile_context>
chip_gen: v7x
topology: tpu7x:2x2x1
jax: 0.10.0
libtpu: 0.0.40
codegen_flags: <defaults>
</compile_context>

<pallas_src>
import functools

import jax
import jax.numpy as jnp
from jax.experimental import pallas as pl
from jax.experimental.pallas import tpu as pltpu

_MiB = 1024 * 1024


# --------------------------------------------------------------------------- #
# Kernel
# --------------------------------------------------------------------------- #
def mhsa_kernel(x_ref, wqkv_ref, wo_ref, o_ref, ctx_ref, *,
                n_heads, d_k, batch_block, seq_len, compute_dtype):
    H, dk, Bb, S = n_heads, d_k, batch_block, seq_len
    hd = H * dk
    rows = Bb * S

    x = x_ref[...].astype(compute_dtype)     # (rows, D); cast is cheap VPU work
    wqkv = wqkv_ref[...]                     # (D, 3*hd); Q cols pre-scaled by d_k**-0.5
    wo = wo_ref[...]                         # (hd, D)

    # Fused QKV projection: one wide MXU pass (f32 accumulation inside the MXU).
    qkv = jnp.dot(x, wqkv, preferred_element_type=compute_dtype)   # (rows, 3*hd)

    approx = jnp.dtype(compute_dtype) != jnp.dtype(jnp.float32)

    # Per-head attention.  Heads stay a static loop (see header note); each
    # head's context is parked in VMEM scratch so its intermediates die early.
    for h in range(H):
        q = qkv[:, h * dk:(h + 1) * dk].reshape(Bb, S, dk)
        k = qkv[:, hd + h * dk:hd + (h + 1) * dk].reshape(Bb, S, dk)
        v = qkv[:, 2 * hd + h * dk:2 * hd + (h + 1) * dk].reshape(Bb, S, dk)

        # scores: contract over d_k, batch over Bb (MXU takes the transposed
        # contraction natively -> no explicit k transpose).
        s = jax.lax.dot_general(
            q, k,
            dimension_numbers=(((2,), (2,)), ((0,), (0,))),
            preferred_element_type=jnp.float32)                    # (Bb, S, S)
        s = jnp.clip(s, -5.0, 5.0)

        # The +-5 clip bounds the scores, so exp() cannot overflow and the
        # usual row-max subtraction is redundant (softmax is shift invariant).
        # NOTE: the clip and the missing max-subtraction are coupled.
        p = jnp.exp(s)
        p = p * pl.reciprocal(jnp.sum(p, axis=-1, keepdims=True), approx=approx)

        ctx = jax.lax.dot_general(
            p.astype(compute_dtype), v,
            dimension_numbers=(((2,), (1,)), ((0,), (0,))),
            preferred_element_type=compute_dtype)                  # (Bb, S, dk)
        ctx_ref[:, h * dk:(h + 1) * dk] = ctx.reshape(rows, dk)

    # Single output projection with K = hd (better MXU contraction fill than
    # H per-head K=d_k matmuls, and no (H-1) full-tile accumulator adds).
    out = jnp.dot(ctx_ref[...], wo, preferred_element_type=jnp.float32)
    o_ref[...] = out.astype(o_ref.dtype)


# --------------------------------------------------------------------------- #
# Tiling / VMEM-budget logic
# --------------------------------------------------------------------------- #
def _tpu_vmem_and_cores():
    """Best-effort hardware query; falls back to conservative (v7x) numbers."""
    vmem_bytes, num_cores = 64 * _MiB, 1
    try:
        info = pltpu.get_tpu_info()
        vmem_bytes = int(getattr(info, "vmem_capacity_bytes", vmem_bytes))
        for attr in ("num_tensorcores", "tensorcores_per_chip", "num_cores",
                     "core_count"):
            val = getattr(info, attr, None)
            if val is not None:
                try:
                    num_cores = max(1, int(val))
                    break
                except (TypeError, ValueError):
                    continue
    except Exception:
        pass
    return vmem_bytes, num_cores


def _block_vmem_bytes(bb, S, D, n_heads, d_k, cbytes):
    """Rough per-grid-step VMEM footprint (double-buffered I/O + intermediates)."""
    rows = bb * S
    hd = n_heads * d_k
    total = 0
    total += 2 * 2 * rows * D * 4              # in + out f32 blocks, double-buffered
    total += rows * 3 * hd * cbytes            # fused qkv
    total += rows * hd * cbytes                # ctx scratch
    total += 4 * bb * S * max(S, 128) * 4      # one head's scores / probs (lane-padded)
    total += rows * max(D, 128) * 4            # f32 result of the final projection
    return total


def _choose_batch_block(B, S, D, n_heads, d_k, compute_dtype):
    """Largest batch fold that fits the VMEM budget; >=2 balanced grid steps
    are only enforced on multi-TensorCore chips (v7x)."""
    vmem_bytes, num_cores = _tpu_vmem_and_cores()
    cbytes = jnp.dtype(compute_dtype).itemsize
    hd = n_heads * d_k
    weight_bytes = 2 * (D * 3 * hd + hd * D) * cbytes     # double-buffered weight blocks
    budget = vmem_bytes // 2 - weight_bytes                # headroom for compiler scratch

    fits = [bb for bb in range(1, B + 1)
            if B % bb == 0
            and ((bb * S) % 8 == 0 or bb == B)             # (8,128) second-minor rule
            and _block_vmem_bytes(bb, S, D, n_heads, d_k, cbytes) <= budget]
    if not fits:
        # TODO(synk): tile the sequence / KV dimension for very long n_nodes
        # (scores are O(S^2) per block); fall back to one batch element per step.
        fits = [1]

    best = max(fits)
    if num_cores > 1:
        balanced = [bb for bb in fits if (B // bb) % num_cores == 0]
        if balanced:
            best = max(balanced)

    need = weight_bytes + _block_vmem_bytes(best, S, D, n_heads, d_k, cbytes)
    vmem_limit = int(min(vmem_bytes * 3 // 4, max(32 * _MiB, 3 * need)))
    return best, vmem_limit


# --------------------------------------------------------------------------- #
# Wrapper
# --------------------------------------------------------------------------- #
def prepare_mhsa_weights(wq_t, wk_t, wv_t, wo_t, *, d_k,
                         compute_dtype=jnp.bfloat16):
    """One-time parameter prep (call at init, NOT per forward): fuse Wq/Wk/Wv
    into one (D, 3*H*d_k) matrix, fold 1/sqrt(d_k) into the Q columns, and
    cast to the MXU compute dtype."""
    scale = jnp.float32(d_k) ** -0.5
    w_qkv = jnp.concatenate([wq_t * scale, wk_t, wv_t], axis=1)
    return w_qkv.astype(compute_dtype), wo_t.astype(compute_dtype)


def multi_head_self_attention(n, w_qkv, wo, *, n_heads, d_k,
                              compute_dtype=jnp.bfloat16):
    """n: (B, S, D) f32.  w_qkv: (D, 3*H*d_k), wo: (H*d_k, D) from
    prepare_mhsa_weights.  Returns (B, S, D) f32."""
    B, S, D = n.shape
    hd = n_heads * d_k
    assert w_qkv.shape == (D, 3 * hd) and wo.shape == (hd, D)

    # 2-D activation slab: metadata-only reshape in XLA; lane-dense DMA/stores
    # when D is a multiple of 128.
    x2 = n.reshape(B * S, D)

    Bb, vmem_limit = _choose_batch_block(B, S, D, n_heads, d_k, compute_dtype)
    rows_blk = Bb * S

    kernel = functools.partial(
        mhsa_kernel, n_heads=n_heads, d_k=d_k, batch_block=Bb, seq_len=S,
        compute_dtype=compute_dtype)

    out2 = pl.pallas_call(
        kernel,
        out_shape=jax.ShapeDtypeStruct((B * S, D), jnp.float32),
        grid_spec=pltpu.PrefetchScalarGridSpec(
            num_scalar_prefetch=0,
            grid=(B // Bb,),
            in_specs=[
                pl.BlockSpec((rows_blk, D), lambda b: (b, 0)),
                # Constant index maps: weights are DMA'd once and stay resident.
                pl.BlockSpec((D, 3 * hd), lambda b: (0, 0)),
                pl.BlockSpec((hd, D), lambda b: (0, 0)),
            ],
            out_specs=pl.BlockSpec((rows_blk, D), lambda b: (b, 0)),
            scratch_shapes=[pltpu.VMEM((rows_blk, hd), compute_dtype)],
        ),
        compiler_params=pltpu.CompilerParams(
            dimension_semantics=("parallel",),
            vmem_limit_bytes=vmem_limit),
    )(x2, w_qkv, wo)
    return out2.reshape(B, S, D)


# --------------------------------------------------------------------------- #
# Pure-JAX reference mirroring the PyTorch module exactly
# --------------------------------------------------------------------------- #
def reference_mhsa(n, wq_t, wk_t, wv_t, wo_t, *, n_heads, d_k):
    B, S, D = n.shape
    q = (n @ wq_t).reshape(B, S, n_heads, d_k).transpose(0, 2, 1, 3)
    k = (n @ wk_t).reshape(B, S, n_heads, d_k).transpose(0, 2, 1, 3)
    v = (n @ wv_t).reshape(B, S, n_heads, d_k).transpose(0, 2, 1, 3)
    a = jnp.einsum('bhqd,bhkd->bhqk', q, k) * (d_k ** -0.5)
    a = jnp.clip(a, -5.0, 5.0)
    a = jax.nn.softmax(a, axis=-1)
    ctx = jnp.einsum('bhqk,bhkd->bhqd', a, v)
    ctx = ctx.transpose(0, 2, 1, 3).reshape(B, S, n_heads * d_k)
    return ctx @ wo_t


if __name__ == "__main__":
    # Small shapes consistent with the module; d_emb chosen as a multiple of
    # 128 so the 2-D activation slabs are lane-dense on the TPU (perf review
    # item: no masked 32-lane stores).
    B, S = 2, 8                     # batch, n_nodes
    d_emb, n_heads = 128, 8
    d_k = d_emb // n_heads

    key = jax.random.PRNGKey(0)
    kx, kq, kk, kv, ko = jax.random.split(key, 5)

    x = jax.random.normal(kx, (B, S, d_emb), dtype=jnp.float32)
    limit = 1.0 / (d_emb ** 0.5)    # ~ PyTorch nn.Linear init range
    wq_t = jax.random.uniform(kq, (d_emb, n_heads * d_k), jnp.float32, -limit, limit)
    wk_t = jax.random.uniform(kk, (d_emb, n_heads * d_k), jnp.float32, -limit, limit)
    wv_t = jax.random.uniform(kv, (d_emb, n_heads * d_k), jnp.float32, -limit, limit)
    wo_t = jax.random.uniform(ko, (n_heads * d_k, d_emb), jnp.float32, -limit, limit)

    ref = reference_mhsa(x, wq_t, wk_t, wv_t, wo_t, n_heads=n_heads, d_k=d_k)

    # f32 matmul path (high precision parity check).
    wqkv32, wo32 = prepare_mhsa_weights(wq_t, wk_t, wv_t, wo_t, d_k=d_k,
                                        compute_dtype=jnp.float32)
    out32 = multi_head_self_attention(x, wqkv32, wo32, n_heads=n_heads, d_k=d_k,
                                      compute_dtype=jnp.float32)
    out32 = jax.block_until_ready(out32)
    assert out32.shape == (B, S, d_emb)
    assert jnp.allclose(out32, ref, atol=2e-4, rtol=2e-4), "f32 path mismatch"

    # bf16 matmul path (MXU-native; production default per the perf review).
    wqkv16, wo16 = prepare_mhsa_weights(wq_t, wk_t, wv_t, wo_t, d_k=d_k,
                                        compute_dtype=jnp.bfloat16)
    out16 = multi_head_self_attention(x, wqkv16, wo16, n_heads=n_heads, d_k=d_k,
                                      compute_dtype=jnp.bfloat16)
    out16 = jax.block_until_ready(out16)
    assert out16.shape == (B, S, d_emb)
    assert jnp.allclose(out16, ref, atol=3e-2, rtol=3e-2), "bf16 path mismatch"

    print("KERNEL_OK")
</pallas_src>

<mosaic_0001>
module attributes {stable_mosaic.version = 11 : i64} {
  func.func @mhsa_kernel(%arg0: i32, %arg1: memref<16x128xf32, #tpu.memory_space<vmem>>, %arg2: memref<128x384xf32, #tpu.memory_space<vmem>>, %arg3: memref<128x128xf32, #tpu.memory_space<vmem>>, %arg4: memref<16x128xf32, #tpu.memory_space<vmem>>, %arg5: memref<16x128xf32, #tpu.memory_space<vmem>>) attributes {dimension_semantics = [#tpu.dimension_semantics<parallel>], iteration_bounds = array<i64: 1>, scalar_prefetch = 0 : i64, scratch_operands = 1 : i64, tpu.core_type = #tpu.core_type<tc>, window_params = [{transform_indices = @transform_0, window_bounds = array<i64: 16, 128>}, {pipeline_mode = #tpu.pipeline_mode<synchronous>, transform_indices = @transform_1, window_bounds = array<i64: 128, 384>}, {pipeline_mode = #tpu.pipeline_mode<synchronous>, transform_indices = @transform_2, window_bounds = array<i64: 128, 128>}, {transform_indices = @transform_3, window_bounds = array<i64: 16, 128>}]} {
    %c0 = arith.constant 0 : index
    %c0_0 = arith.constant 0 : index
    %0 = vector.load %arg1[%c0, %c0_0] : memref<16x128xf32, #tpu.memory_space<vmem>>, vector<16x128xf32>
    %c0_1 = arith.constant 0 : index
    %c0_2 = arith.constant 0 : index
    %1 = vector.load %arg2[%c0_1, %c0_2] : memref<128x384xf32, #tpu.memory_space<vmem>>, vector<128x384xf32>
    %c0_3 = arith.constant 0 : index
    %c0_4 = arith.constant 0 : index
    %2 = vector.load %arg3[%c0_3, %c0_4] : memref<128x128xf32, #tpu.memory_space<vmem>>, vector<128x128xf32>
    %cst = arith.constant dense<0.000000e+00> : vector<16x384xf32>
    %3 = tpu.matmul %0, %1, %cst {dimension_numbers = #tpu.dot_dimension_numbers<[1], [0], [0], [1], [0, 0, 1, 1], [], []>} : vector<16x128xf32>, vector<128x384xf32>, vector<16x384xf32> -> vector<16x384xf32>
    %4 = vector.extract_strided_slice %3 {offsets = [0, 0], sizes = [16, 16], strides = [1, 1]} : vector<16x384xf32> to vector<16x16xf32>
    %5 = vector.shape_cast %4 : vector<16x16xf32> to vector<2x8x16xf32>
    %6 = vector.extract_strided_slice %3 {offsets = [0, 128], sizes = [16, 16], strides = [1, 1]} : vector<16x384xf32> to vector<16x16xf32>
    %7 = vector.shape_cast %6 : vector<16x16xf32> to vector<2x8x16xf32>
    %8 = vector.extract_strided_slice %3 {offsets = [0, 256], sizes = [16, 16], strides = [1, 1]} : vector<16x384xf32> to vector<16x16xf32>
    %9 = vector.shape_cast %8 : vector<16x16xf32> to vector<2x8x16xf32>
    %cst_5 = arith.constant dense<0.000000e+00> : vector<2x8x8xf32>
    %10 = tpu.matmul %5, %7, %cst_5 {dimension_numbers = #tpu.dot_dimension_numbers<[2], [2], [1], [1], [0, 0, 0, 1, 1, 1], [0], [0]>} : vector<2x8x16xf32>, vector<2x8x16xf32>, vector<2x8x8xf32> -> vector<2x8x8xf32>
    %cst_6 = arith.constant -5.000000e+00 : f32
    %cst_7 = arith.constant 5.000000e+00 : f32
    %11 = vector.broadcast %cst_6 : f32 to vector<2x8x8xf32>
    %12 = arith.maximumf %11, %10 : vector<2x8x8xf32>
    %13 = vector.broadcast %cst_7 : f32 to vector<2x8x8xf32>
    %14 = arith.minimumf %13, %12 : vector<2x8x8xf32>
    %15 = math.exp %14 : vector<2x8x8xf32>
    %cst_8 = arith.constant dense<0.000000e+00> : vector<2x8xf32>
    %16 = vector.multi_reduction <add>, %15, %cst_8 [2] : vector<2x8x8xf32> to vector<2x8xf32>
    %17 = vector.shape_cast %16 : vector<2x8xf32> to vector<2x8x1xf32>
    %18 = tpu.reciprocal %17 : vector<2x8x1xf32> -> vector<2x8x1xf32>
    %19 = vector.broadcast %18 : vector<2x8x1xf32> to vector<2x8x8xf32>
    %20 = arith.mulf %15, %19 : vector<2x8x8xf32>
    %cst_9 = arith.constant dense<0.000000e+00> : vector<2x8x16xf32>
    %21 = tpu.matmul %20, %9, %cst_9 {dimension_numbers = #tpu.dot_dimension_numbers<[2], [1], [1], [2], [0, 0, 0, 1, 1, 2], [0], [0]>} : vector<2x8x8xf32>, vector<2x8x16xf32>, vector<2x8x16xf32> -> vector<2x8x16xf32>
    %22 = vector.shape_cast %21 : vector<2x8x16xf32> to vector<16x16xf32>
    %c0_10 = arith.constant 0 : index
    %c0_11 = arith.constant 0 : index
    %23 = vector.load %arg5[%c0_10, %c0_11] : memref<16x128xf32, #tpu.memory_space<vmem>>, vector<16x16xf32>
    tpu.vector_store %arg5[%c0_10, %c0_11], %22 {strides = array<i32>} : memref<16x128xf32, #tpu.memory_space<vmem>>, vector<16x16xf32>,
    %24 = vector.extract_strided_slice %3 {offsets = [0, 16], sizes = [16, 16], strides = [1, 1]} : vector<16x384xf32> to vector<16x16xf32>
    %25 = vector.shape_cast %24 : vector<16x16xf32> to vector<2x8x16xf32>
    %26 = vector.extract_strided_slice %3 {offsets = [0, 144], sizes = [16, 16], strides = [1, 1]} : vector<16x384xf32> to vector<16x16xf32>
    %27 = vector.shape_cast %26 : vector<16x16xf32> to vector<2x8x16xf32>
    %28 = vector.extract_strided_slice %3 {offsets = [0, 272], sizes = [16, 16], strides = [1, 1]} : vector<16x384xf32> to vector<16x16xf32>
    %29 = vector.shape_cast %28 : vector<16x16xf32> to vector<2x8x16xf32>
    %cst_12 = arith.constant dense<0.000000e+00> : vector<2x8x8xf32>
    %30 = tpu.matmul %25, %27, %cst_12 {dimension_numbers = #tpu.dot_dimension_numbers<[2], [2], [1], [1], [0, 0, 0, 1, 1, 1], [0], [0]>} : vector<2x8x16xf32>, vector<2x8x16xf32>, vector<2x8x8xf32> -> vector<2x8x8xf32>
    %cst_13 = arith.constant -5.000000e+00 : f32
    %cst_14 = arith.constant 5.000000e+00 : f32
    %31 = vector.broadcast %cst_13 : f32 to vector<2x8x8xf32>
    %32 = arith.maximumf %31, %30 : vector<2x8x8xf32>
    %33 = vector.broadcast %cst_14 : f32 to vector<2x8x8xf32>
    %34 = arith.minimumf %33, %32 : vector<2x8x8xf32>
    %35 = math.exp %34 : vector<2x8x8xf32>
    %cst_15 = arith.constant dense<0.000000e+00> : vector<2x8xf32>
    %36 = vector.multi_reduction <add>, %35, %cst_15 [2] : vector<2x8x8xf32> to vector<2x8xf32>
    %37 = vector.shape_cast %36 : vector<2x8xf32> to vector<2x8x1xf32>
    %38 = tpu.reciprocal %37 : vector<2x8x1xf32> -> vector<2x8x1xf32>
    %39 = vector.broadcast %38 : vector<2x8x1xf32> to vector<2x8x8xf32>
    %40 = arith.mulf %35, %39 : vector<2x8x8xf32>
    %cst_16 = arith.constant dense<0.000000e+00> : vector<2x8x16xf32>
    %41 = tpu.matmul %40, %29, %cst_16 {dimension_numbers = #tpu.dot_dimension_numbers<[2], [1], [1], [2], [0, 0, 0, 1, 1, 2], [0], [0]>} : vector<2x8x8xf32>, vector<2x8x16xf32>, vector<2x8x16xf32> -> vector<2x8x16xf32>
    %42 = vector.shape_cast %41 : vector<2x8x16xf32> to vector<16x16xf32>
    %c0_17 = arith.constant 0 : index
    %c16 = arith.constant 16 : index
    %43 = vector.load %arg5[%c0_17, %c16] : memref<16x128xf32, #tpu.memory_space<vmem>>, vector<16x16xf32>
    tpu.vector_store %arg5[%c0_17, %c16], %42 {strides = array<i32>} : memref<16x128xf32, #tpu.memory_space<vmem>>, vector<16x16xf32>,
    %44 = vector.extract_strided_slice %3 {offsets = [0, 32], sizes = [16, 16], strides = [1, 1]} : vector<16x384xf32> to vector<16x16xf32>
    %45 = vector.shape_cast %44 : vector<16x16xf32> to vector<2x8x16xf32>
    %46 = vector.extract_strided_slice %3 {offsets = [0, 160], sizes = [16, 16], strides = [1, 1]} : vector<16x384xf32> to vector<16x16xf32>
    %47 = vector.shape_cast %46 : vector<16x16xf32> to vector<2x8x16xf32>
    %48 = vector.extract_strided_slice %3 {offsets = [0, 288], sizes = [16, 16], strides = [1, 1]} : vector<16x384xf32> to vector<16x16xf32>
    %49 = vector.shape_cast %48 : vector<16x16xf32> to vector<2x8x16xf32>
    %cst_18 = arith.constant dense<0.000000e+00> : vector<2x8x8xf32>
    %50 = tpu.matmul %45, %47, %cst_18 {dimension_numbers = #tpu.dot_dimension_numbers<[2], [2], [1], [1], [0, 0, 0, 1, 1, 1], [0], [0]>} : vector<2x8x16xf32>, vector<2x8x16xf32>, vector<2x8x8xf32> -> vector<2x8x8xf32>
    %cst_19 = arith.constant -5.000000e+00 : f32
    %cst_20 = arith.constant 5.000000e+00 : f32
    %51 = vector.broadcast %cst_19 : f32 to vector<2x8x8xf32>
    %52 = arith.maximumf %51, %50 : vector<2x8x8xf32>
    %53 = vector.broadcast %cst_20 : f32 to vector<2x8x8xf32>
    %54 = arith.minimumf %53, %52 : vector<2x8x8xf32>
    %55 = math.exp %54 : vector<2x8x8xf32>
    %cst_21 = arith.constant dense<0.000000e+00> : vector<2x8xf32>
    %56 = vector.multi_reduction <add>, %55, %cst_21 [2] : vector<2x8x8xf32> to vector<2x8xf32>
    %57 = vector.shape_cast %56 : vector<2x8xf32> to vector<2x8x1xf32>
    %58 = tpu.reciprocal %57 : vector<2x8x1xf32> -> vector<2x8x1xf32>
    %59 = vector.broadcast %58 : vector<2x8x1xf32> to vector<2x8x8xf32>
    %60 = arith.mulf %55, %59 : vector<2x8x8xf32>
    %cst_22 = arith.constant dense<0.000000e+00> : vector<2x8x16xf32>
    %61 = tpu.matmul %60, %49, %cst_22 {dimension_numbers = #tpu.dot_dimension_numbers<[2], [1], [1], [2], [0, 0, 0, 1, 1, 2], [0], [0]>} : vector<2x8x8xf32>, vector<2x8x16xf32>, vector<2x8x16xf32> -> vector<2x8x16xf32>
    %62 = vector.shape_cast %61 : vector<2x8x16xf32> to vector<16x16xf32>
    %c0_23 = arith.constant 0 : index
    %c32 = arith.constant 32 : index
    %63 = vector.load %arg5[%c0_23, %c32] : memref<16x128xf32, #tpu.memory_space<vmem>>, vector<16x16xf32>
    tpu.vector_store %arg5[%c0_23, %c32], %62 {strides = array<i32>} : memref<16x128xf32, #tpu.memory_space<vmem>>, vector<16x16xf32>,
    %64 = vector.extract_strided_slice %3 {offsets = [0, 48], sizes = [16, 16], strides = [1, 1]} : vector<16x384xf32> to vector<16x16xf32>
    %65 = vector.shape_cast %64 : vector<16x16xf32> to vector<2x8x16xf32>
    %66 = vector.extract_strided_slice %3 {offsets = [0, 176], sizes = [16, 16], strides = [1, 1]} : vector<16x384xf32> to vector<16x16xf32>
    %67 = vector.shape_cast %66 : vector<16x16xf32> to vector<2x8x16xf32>
    %68 = vector.extract_strided_slice %3 {offsets = [0, 304], sizes = [16, 16], strides = [1, 1]} : vector<16x384xf32> to vector<16x16xf32>
    %69 = vector.shape_cast %68 : vector<16x16xf32> to vector<2x8x16xf32>
    %cst_24 = arith.constant dense<0.000000e+00> : vector<2x8x8xf32>
    %70 = tpu.matmul %65, %67, %cst_24 {dimension_numbers = #tpu.dot_dimension_numbers<[2], [2], [1], [1], [0, 0, 0, 1, 1, 1], [0], [0]>} : vector<2x8x16xf32>, vector<2x8x16xf32>, vector<2x8x8xf32> -> vector<2x8x8xf32>
    %cst_25 = arith.constant -5.000000e+00 : f32
    %cst_26 = arith.constant 5.000000e+00 : f32
    %71 = vector.broadcast %cst_25 : f32 to vector<2x8x8xf32>
    %72 = arith.maximumf %71, %70 : vector<2x8x8xf32>
    %73 = vector.broadcast %cst_26 : f32 to vector<2x8x8xf32>
    %74 = arith.minimumf %73, %72 : vector<2x8x8xf32>
    %75 = math.exp %74 : vector<2x8x8xf32>
    %cst_27 = arith.constant dense<0.000000e+00> : vector<2x8xf32>
    %76 = vector.multi_reduction <add>, %75, %cst_27 [2] : vector<2x8x8xf32> to vector<2x8xf32>
    %77 = vector.shape_cast %76 : vector<2x8xf32> to vector<2x8x1xf32>
    %78 = tpu.reciprocal %77 : vector<2x8x1xf32> -> vector<2x8x1xf32>
    %79 = vector.broadcast %78 : vector<2x8x1xf32> to vector<2x8x8xf32>
    %80 = arith.mulf %75, %79 : vector<2x8x8xf32>
    %cst_28 = arith.constant dense<0.000000e+00> : vector<2x8x16xf32>
    %81 = tpu.matmul %80, %69, %cst_28 {dimension_numbers = #tpu.dot_dimension_numbers<[2], [1], [1], [2], [0, 0, 0, 1, 1, 2], [0], [0]>} : vector<2x8x8xf32>, vector<2x8x16xf32>, vector<2x8x16xf32> -> vector<2x8x16xf32>
    %82 = vector.shape_cast %81 : vector<2x8x16xf32> to vector<16x16xf32>
    %c0_29 = arith.constant 0 : index
    %c48 = arith.constant 48 : index
    %83 = vector.load %arg5[%c0_29, %c48] : memref<16x128xf32, #tpu.memory_space<vmem>>, vector<16x16xf32>
    tpu.vector_store %arg5[%c0_29, %c48], %82 {strides = array<i32>} : memref<16x128xf32, #tpu.memory_space<vmem>>, vector<16x16xf32>,
    %84 = vector.extract_strided_slice %3 {offsets = [0, 64], sizes = [16, 16], strides = [1, 1]} : vector<16x384xf32> to vector<16x16xf32>
    %85 = vector.shape_cast %84 : vector<16x16xf32> to vector<2x8x16xf32>
    %86 = vector.extract_strided_slice %3 {offsets = [0, 192], sizes = [16, 16], strides = [1, 1]} : vector<16x384xf32> to vector<16x16xf32>
    %87 = vector.shape_cast %86 : vector<16x16xf32> to vector<2x8x16xf32>
    %88 = vector.extract_strided_slice %3 {offsets = [0, 320], sizes = [16, 16], strides = [1, 1]} : vector<16x384xf32> to vector<16x16xf32>
    %89 = vector.shape_cast %88 : vector<16x16xf32> to vector<2x8x16xf32>
    %cst_30 = arith.constant dense<0.000000e+00> : vector<2x8x8xf32>
    %90 = tpu.matmul %85, %87, %cst_30 {dimension_numbers = #tpu.dot_dimension_numbers<[2], [2], [1], [1], [0, 0, 0, 1, 1, 1], [0], [0]>} : vector<2x8x16xf32>, vector<2x8x16xf32>, vector<2x8x8xf32> -> vector<2x8x8xf32>
    %cst_31 = arith.constant -5.000000e+00 : f32
    %cst_32 = arith.constant 5.000000e+00 : f32
    %91 = vector.broadcast %cst_31 : f32 to vector<2x8x8xf32>
    %92 = arith.maximumf %91, %90 : vector<2x8x8xf32>
    %93 = vector.broadcast %cst_32 : f32 to vector<2x8x8xf32>
    %94 = arith.minimumf %93, %92 : vector<2x8x8xf32>
    %95 = math.exp %94 : vector<2x8x8xf32>
    %cst_33 = arith.constant dense<0.000000e+00> : vector<2x8xf32>
    %96 = vector.multi_reduction <add>, %95, %cst_33 [2] : vector<2x8x8xf32> to vector<2x8xf32>
    %97 = vector.shape_cast %96 : vector<2x8xf32> to vector<2x8x1xf32>
    %98 = tpu.reciprocal %97 : vector<2x8x1xf32> -> vector<2x8x1xf32>
    %99 = vector.broadcast %98 : vector<2x8x1xf32> to vector<2x8x8xf32>
    %100 = arith.mulf %95, %99 : vector<2x8x8xf32>
    %cst_34 = arith.constant dense<0.000000e+00> : vector<2x8x16xf32>
    %101 = tpu.matmul %100, %89, %cst_34 {dimension_numbers = #tpu.dot_dimension_numbers<[2], [1], [1], [2], [0, 0, 0, 1, 1, 2], [0], [0]>} : vector<2x8x8xf32>, vector<2x8x16xf32>, vector<2x8x16xf32> -> vector<2x8x16xf32>
    %102 = vector.shape_cast %101 : vector<2x8x16xf32> to vector<16x16xf32>
    %c0_35 = arith.constant 0 : index
    %c64 = arith.constant 64 : index
    %103 = vector.load %arg5[%c0_35, %c64] : memref<16x128xf32, #tpu.memory_space<vmem>>, vector<16x16xf32>
    tpu.vector_store %arg5[%c0_35, %c64], %102 {strides = array<i32>} : memref<16x128xf32, #tpu.memory_space<vmem>>, vector<16x16xf32>,
    %104 = vector.extract_strided_slice %3 {offsets = [0, 80], sizes = [16, 16], strides = [1, 1]} : vector<16x384xf32> to vector<16x16xf32>
    %105 = vector.shape_cast %104 : vector<16x16xf32> to vector<2x8x16xf32>
    %106 = vector.extract_strided_slice %3 {offsets = [0, 208], sizes = [16, 16], strides = [1, 1]} : vector<16x384xf32> to vector<16x16xf32>
    %107 = vector.shape_cast %106 : vector<16x16xf32> to vector<2x8x16xf32>
    %108 = vector.extract_strided_slice %3 {offsets = [0, 336], sizes = [16, 16], strides = [1, 1]} : vector<16x384xf32> to vector<16x16xf32>
    %109 = vector.shape_cast %108 : vector<16x16xf32> to vector<2x8x16xf32>
    %cst_36 = arith.constant dense<0.000000e+00> : vector<2x8x8xf32>
    %110 = tpu.matmul %105, %107, %cst_36 {dimension_numbers = #tpu.dot_dimension_numbers<[2], [2], [1], [1], [0, 0, 0, 1, 1, 1], [0], [0]>} : vector<2x8x16xf32>, vector<2x8x16xf32>, vector<2x8x8xf32> -> vector<2x8x8xf32>
    %cst_37 = arith.constant -5.000000e+00 : f32
    %cst_38 = arith.constant 5.000000e+00 : f32
    %111 = vector.broadcast %cst_37 : f32 to vector<2x8x8xf32>
    %112 = arith.maximumf %111, %110 : vector<2x8x8xf32>
    %113 = vector.broadcast %cst_38 : f32 to vector<2x8x8xf32>
    %114 = arith.minimumf %113, %112 : vector<2x8x8xf32>
    %115 = math.exp %114 : vector<2x8x8xf32>
    %cst_39 = arith.constant dense<0.000000e+00> : vector<2x8xf32>
    %116 = vector.multi_reduction <add>, %115, %cst_39 [2] : vector<2x8x8xf32> to vector<2x8xf32>
    %117 = vector.shape_cast %116 : vector<2x8xf32> to vector<2x8x1xf32>
    %118 = tpu.reciprocal %117 : vector<2x8x1xf32> -> vector<2x8x1xf32>
    %119 = vector.broadcast %118 : vector<2x8x1xf32> to vector<2x8x8xf32>
    %120 = arith.mulf %115, %119 : vector<2x8x8xf32>
    %cst_40 = arith.constant dense<0.000000e+00> : vector<2x8x16xf32>
    %121 = tpu.matmul %120, %109, %cst_40 {dimension_numbers = #tpu.dot_dimension_numbers<[2], [1], [1], [2], [0, 0, 0, 1, 1, 2], [0], [0]>} : vector<2x8x8xf32>, vector<2x8x16xf32>, vector<2x8x16xf32> -> vector<2x8x16xf32>
    %122 = vector.shape_cast %121 : vector<2x8x16xf32> to vector<16x16xf32>
    %c0_41 = arith.constant 0 : index
    %c80 = arith.constant 80 : index
    %123 = vector.load %arg5[%c0_41, %c80] : memref<16x128xf32, #tpu.memory_space<vmem>>, vector<16x16xf32>
    tpu.vector_store %arg5[%c0_41, %c80], %122 {strides = array<i32>} : memref<16x128xf32, #tpu.memory_space<vmem>>, vector<16x16xf32>,
    %124 = vector.extract_strided_slice %3 {offsets = [0, 96], sizes = [16, 16], strides = [1, 1]} : vector<16x384xf32> to vector<16x16xf32>
    %125 = vector.shape_cast %124 : vector<16x16xf32> to vector<2x8x16xf32>
    %126 = vector.extract_strided_slice %3 {offsets = [0, 224], sizes = [16, 16], strides = [1, 1]} : vector<16x384xf32> to vector<16x16xf32>
    %127 = vector.shape_cast %126 : vector<16x16xf32> to vector<2x8x16xf32>
    %128 = vector.extract_strided_slice %3 {offsets = [0, 352], sizes = [16, 16], strides = [1, 1]} : vector<16x384xf32> to vector<16x16xf32>
    %129 = vector.shape_cast %128 : vector<16x16xf32> to vector<2x8x16xf32>
    %cst_42 = arith.constant dense<0.000000e+00> : vector<2x8x8xf32>
    %130 = tpu.matmul %125, %127, %cst_42 {dimension_numbers = #tpu.dot_dimension_numbers<[2], [2], [1], [1], [0, 0, 0, 1, 1, 1], [0], [0]>} : vector<2x8x16xf32>, vector<2x8x16xf32>, vector<2x8x8xf32> -> vector<2x8x8xf32>
    %cst_43 = arith.constant -5.000000e+00 : f32
    %cst_44 = arith.constant 5.000000e+00 : f32
    %131 = vector.broadcast %cst_43 : f32 to vector<2x8x8xf32>
    %132 = arith.maximumf %131, %130 : vector<2x8x8xf32>
    %133 = vector.broadcast %cst_44 : f32 to vector<2x8x8xf32>
    %134 = arith.minimumf %133, %132 : vector<2x8x8xf32>
    %135 = math.exp %134 : vector<2x8x8xf32>
    %cst_45 = arith.constant dense<0.000000e+00> : vector<2x8xf32>
    %136 = vector.multi_reduction <add>, %135, %cst_45 [2] : vector<2x8x8xf32> to vector<2x8xf32>
    %137 = vector.shape_cast %136 : vector<2x8xf32> to vector<2x8x1xf32>
    %138 = tpu.reciprocal %137 : vector<2x8x1xf32> -> vector<2x8x1xf32>
    %139 = vector.broadcast %138 : vector<2x8x1xf32> to vector<2x8x8xf32>
    %140 = arith.mulf %135, %139 : vector<2x8x8xf32>
    %cst_46 = arith.constant dense<0.000000e+00> : vector<2x8x16xf32>
    %141 = tpu.matmul %140, %129, %cst_46 {dimension_numbers = #tpu.dot_dimension_numbers<[2], [1], [1], [2], [0, 0, 0, 1, 1, 2], [0], [0]>} : vector<2x8x8xf32>, vector<2x8x16xf32>, vector<2x8x16xf32> -> vector<2x8x16xf32>
    %142 = vector.shape_cast %141 : vector<2x8x16xf32> to vector<16x16xf32>
    %c0_47 = arith.constant 0 : index
    %c96 = arith.constant 96 : index
    %143 = vector.load %arg5[%c0_47, %c96] : memref<16x128xf32, #tpu.memory_space<vmem>>, vector<16x16xf32>
    tpu.vector_store %arg5[%c0_47, %c96], %142 {strides = array<i32>} : memref<16x128xf32, #tpu.memory_space<vmem>>, vector<16x16xf32>,
    %144 = vector.extract_strided_slice %3 {offsets = [0, 112], sizes = [16, 16], strides = [1, 1]} : vector<16x384xf32> to vector<16x16xf32>
    %145 = vector.shape_cast %144 : vector<16x16xf32> to vector<2x8x16xf32>
    %146 = vector.extract_strided_slice %3 {offsets = [0, 240], sizes = [16, 16], strides = [1, 1]} : vector<16x384xf32> to vector<16x16xf32>
    %147 = vector.shape_cast %146 : vector<16x16xf32> to vector<2x8x16xf32>
    %148 = vector.extract_strided_slice %3 {offsets = [0, 368], sizes = [16, 16], strides = [1, 1]} : vector<16x384xf32> to vector<16x16xf32>
    %149 = vector.shape_cast %148 : vector<16x16xf32> to vector<2x8x16xf32>
    %cst_48 = arith.constant dense<0.000000e+00> : vector<2x8x8xf32>
    %150 = tpu.matmul %145, %147, %cst_48 {dimension_numbers = #tpu.dot_dimension_numbers<[2], [2], [1], [1], [0, 0, 0, 1, 1, 1], [0], [0]>} : vector<2x8x16xf32>, vector<2x8x16xf32>, vector<2x8x8xf32> -> vector<2x8x8xf32>
    %cst_49 = arith.constant -5.000000e+00 : f32
    %cst_50 = arith.constant 5.000000e+00 : f32
    %151 = vector.broadcast %cst_49 : f32 to vector<2x8x8xf32>
    %152 = arith.maximumf %151, %150 : vector<2x8x8xf32>
    %153 = vector.broadcast %cst_50 : f32 to vector<2x8x8xf32>
    %154 = arith.minimumf %153, %152 : vector<2x8x8xf32>
    %155 = math.exp %154 : vector<2x8x8xf32>
    %cst_51 = arith.constant dense<0.000000e+00> : vector<2x8xf32>
    %156 = vector.multi_reduction <add>, %155, %cst_51 [2] : vector<2x8x8xf32> to vector<2x8xf32>
    %157 = vector.shape_cast %156 : vector<2x8xf32> to vector<2x8x1xf32>
    %158 = tpu.reciprocal %157 : vector<2x8x1xf32> -> vector<2x8x1xf32>
    %159 = vector.broadcast %158 : vector<2x8x1xf32> to vector<2x8x8xf32>
    %160 = arith.mulf %155, %159 : vector<2x8x8xf32>
    %cst_52 = arith.constant dense<0.000000e+00> : vector<2x8x16xf32>
    %161 = tpu.matmul %160, %149, %cst_52 {dimension_numbers = #tpu.dot_dimension_numbers<[2], [1], [1], [2], [0, 0, 0, 1, 1, 2], [0], [0]>} : vector<2x8x8xf32>, vector<2x8x16xf32>, vector<2x8x16xf32> -> vector<2x8x16xf32>
    %162 = vector.shape_cast %161 : vector<2x8x16xf32> to vector<16x16xf32>
    %c0_53 = arith.constant 0 : index
    %c112 = arith.constant 112 : index
    %163 = vector.load %arg5[%c0_53, %c112] : memref<16x128xf32, #tpu.memory_space<vmem>>, vector<16x16xf32>
    tpu.vector_store %arg5[%c0_53, %c112], %162 {strides = array<i32>} : memref<16x128xf32, #tpu.memory_space<vmem>>, vector<16x16xf32>,
    %c0_54 = arith.constant 0 : index
    %c0_55 = arith.constant 0 : index
    %164 = vector.load %arg5[%c0_54, %c0_55] : memref<16x128xf32, #tpu.memory_space<vmem>>, vector<16x128xf32>
    %cst_56 = arith.constant dense<0.000000e+00> : vector<16x128xf32>
    %165 = tpu.matmul %164, %2, %cst_56 {dimension_numbers = #tpu.dot_dimension_numbers<[1], [0], [0], [1], [0, 0, 1, 1], [], []>} : vector<16x128xf32>, vector<128x128xf32>, vector<16x128xf32> -> vector<16x128xf32>
    %c0_57 = arith.constant 0 : index
    %c0_58 = arith.constant 0 : index
    %166 = vector.load %arg4[%c0_57, %c0_58] : memref<16x128xf32, #tpu.memory_space<vmem>>, vector<16x128xf32>
    tpu.vector_store %arg4[%c0_57, %c0_58], %165 {strides = array<i32>} : memref<16x128xf32, #tpu.memory_space<vmem>>, vector<16x128xf32>,
    return
  }
  func.func @transform_0(%arg0: i32) -> (i32, i32) {
    %c0_i32 = arith.constant 0 : i32
    %c0_i32_0 = arith.constant 0 : i32
    return %arg0, %c0_i32 : i32, i32
  }
  func.func @transform_1(%arg0: i32) -> (i32, i32) {
    %c0_i32 = arith.constant 0 : i32
    %c0_i32_0 = arith.constant 0 : i32
    %c0_i32_1 = arith.constant 0 : i32
    return %c0_i32, %c0_i32_0 : i32, i32
  }
  func.func @transform_2(%arg0: i32) -> (i32, i32) {
    %c0_i32 = arith.constant 0 : i32
    %c0_i32_0 = arith.constant 0 : i32
    %c0_i32_1 = arith.constant 0 : i32
    return %c0_i32, %c0_i32_0 : i32, i32
  }
  func.func @transform_3(%arg0: i32) -> (i32, i32) {
    %c0_i32 = arith.constant 0 : i32
    %c0_i32_0 = arith.constant 0 : i32
    return %arg0, %c0_i32 : i32, i32
  }
}

</mosaic_0001>

<bundles_post_ra>
// kernel: tpu_custom_call.1
= control target key start
LH: loop header
LB: loop body
LE: loop exit
PB: predicated region body
PF: predicated region fallthrough
CT: control target
= control target key end

     0   :  { %8 = vsyncpa [#allocation4], 0  ;;  %s4121_s0 = inlined_call_operand.hbm [shape: f32[16,128], index: 0, kind: input, shape index: {}]   ;;  %s4122_s1 = inlined_call_operand.hbm [shape: f32[128,384], index: 1, kind: input, shape index: {}]   ;;  %s4123_s2 = inlined_call_operand.hbm [shape: f32[128,128], index: 2, kind: input, shape index: {}]   ;;  %s4124_s3 = inlined_call_operand.hbm [shape: f32[16,128], index: 3, kind: output, shape index: {}]  }
   0x1   :  { %9 = vsyncpa [#allocation7], 0 }
   0x2   :  { %10 = vsyncpa [#allocation5], 0  ;;  %s3717_s12 = smov [#allocation6]   ;;  %s3623_s16 = scalar_lea.hbm %s4122_s1, 6144 }
   0x3   :  { %s28_s13 = sshll.u32 %s3717_s12, 4  ;;  %p3624_p0 = scmp.ne.s32.totalorder %s4122_s1, %s3623_s16  ;;  %s29_s13 = int_to_ptr.vmem [resolvable:$true] %s28_s13 }
   0x4   :  { %p3627_p1 = scmp.lt.u32.totalorder %s3623_s16, %s4122_s1 }
   0x6   :  { %p3629_p2 = pnand %p3627_p1, %p3624_p0 }
   0x8   :  { %3632 = shalt.err (!%p3629_p2)
}
   0x9   :  { %s3633_s21 = scalar_lea.vmem %s29_s13, 6144  ;;  %p3638_p4 = scmp.lt.s32.totalorder %s29_s13, %s29_s13 }
   0xa   :  { %p3634_p3 = scmp.ne.s32.totalorder %s29_s13, %s3633_s21  ;;  %p3639_p5 = scmp.lt.s32.totalorder %s3633_s21, %s3633_s21 }
   0xc   :  { %p3640_p6 = por %p3639_p5, %p3638_p4 }
   0xe   :  { %p3641_p7 = pnand %p3640_p6, %p3634_p3 }
  0x10   :  { %3644 = shalt.err (!%p3641_p7)
}
  0x11   :  { %s3718_s22 = smov 384   ;;  %s3719_s23 = smov 24  }
  0x12   :  { %34 = dma.hbm_to_vmem [thread:$0]  %s4122_s1, 6144, %s29_s13, [#allocation7], %s3718_s22, %s3718_s22, %s3719_s23  }
  0x13   :  { %s3720_s26 = smov [#allocation3]   ;;  %s3645_s30 = scalar_lea.hbm %s4121_s0, 256 }
  0x14   :  { %s16_s27 = sshll.u32 %s3720_s26, 4  ;;  %p3646_p8 = scmp.ne.s32.totalorder %s4121_s0, %s3645_s30  ;;  %s17_s27 = int_to_ptr.vmem [resolvable:$true] %s16_s27 }
  0x15   :  { %p3649_p9 = scmp.lt.u32.totalorder %s3645_s30, %s4121_s0 }
  0x17   :  { %p3651_p10 = pnand %p3649_p9, %p3646_p8 }
  0x19   :  { %3654 = shalt.err (!%p3651_p10)
}
  0x1a   :  { %s3655_s8 = scalar_lea.vmem %s17_s27, 256  ;;  %p3660_p12 = scmp.lt.s32.totalorder %s17_s27, %s17_s27 }
  0x1b   :  { %p3656_p11 = scmp.ne.s32.totalorder %s17_s27, %s3655_s8  ;;  %p3661_p13 = scmp.lt.s32.totalorder %s3655_s8, %s3655_s8 }
  0x1d   :  { %p3662_p0 = por %p3661_p13, %p3660_p12 }
  0x1f   :  { %p3663_p1 = pnand %p3662_p0, %p3656_p11 }
  0x21   :  { %3666 = shalt.err (!%p3663_p1)
}
  0x22   :  { %s3721_s1 = smov 128   ;;  %s3722_s9 = smov 8  }
  0x23   :  { %22 = dma.hbm_to_vmem [thread:$0]  %s4121_s0, 256, %s17_s27, [#allocation4], %s3721_s1, %s3721_s1, %s3722_s9  }
  0x24   :  { %s3723_s12 = smov [#allocation8]   ;;  %s3667_s16 = scalar_lea.hbm %s4123_s2, 2048 }
  0x25   :  { %s40_s13 = sshll.u32 %s3723_s12, 4  ;;  %p3668_p2 = scmp.ne.s32.totalorder %s4123_s2, %s3667_s16  ;;  %s41_s13 = int_to_ptr.vmem [resolvable:$true] %s40_s13 }
  0x26   :  { %p3671_p3 = scmp.lt.u32.totalorder %s3667_s16, %s4123_s2 }
  0x28   :  { %p3673_p4 = pnand %p3671_p3, %p3668_p2 }
  0x2a   :  { %3676 = shalt.err (!%p3673_p4)
}
  0x2b   :  { %s3677_s21 = scalar_lea.vmem %s41_s13, 2048  ;;  %p3682_p6 = scmp.lt.s32.totalorder %s41_s13, %s41_s13 }
  0x2c   :  { %p3678_p5 = scmp.ne.s32.totalorder %s41_s13, %s3677_s21  ;;  %p3683_p7 = scmp.lt.s32.totalorder %s3677_s21, %s3677_s21 }
  0x2e   :  { %p3684_p8 = por %p3683_p7, %p3682_p6 }
  0x30   :  { %p3685_p9 = pnand %p3684_p8, %p3678_p5 }
  0x32   :  { %3688 = shalt.err (!%p3685_p9)
}
  0x33   :  { %46 = dma.hbm_to_vmem [thread:$0]  %s4123_s2, 2048, %s41_s13, [#allocation7], %s3721_s1, %s3721_s1, %s3722_s9  }
  0x34   :  { %3711 = dma.done.wait [#allocation4], 256  }
  0x35   :  { %3712 = vsyncadd [#allocation4], 4294967040 }
  0x36   :  { %3713 = dma.done.wait [#allocation7], 8192  }
  0x37   :  { %3714 = vsyncadd [#allocation7], 4294959104  ;;  %v3724_v0 = vmov 0.0   ;;  %v59_v1 = vld [vmem:[#allocation6 + $0x8] sm:$0xff]  ;;  %v62_v2 = vld [vmem:[#allocation6 + $0x20] sm:$0xff]  ;;  %vm3725_vm0 = vmmov 0  }
  0x38   :  { %186 = vmatprep.mubr.f32.mxu0 %v3724_v0  ;;  %v58_v3 = vld [vmem:[#allocation6] sm:$0xff]  ;;  %v3446_v4 = vpack.c.bf16 %v62_v2, %v59_v1  ;;  %v61_v5 = vld [vmem:[#allocation6 + $0x18] sm:$0xff]  ;;  %v68_v7 = vld [vmem:[#allocation6 + $0x50] sm:$0xff]  ;;  %vm274_vm1 = vcmask 130048   ;;  %s3726_s2 = smov 112   ;;  %vm435_vm2 = vcmask 64512  }
  0x39   :  { %v65_v6 = vld [vmem:[#allocation6 + $0x38] sm:$0xff]  ;;  %v3448_v8 = vpack.c.bf16 %v61_v5, %v58_v3  ;;  %v64_v10 = vld [vmem:[#allocation6 + $0x30] sm:$0xff]  ;;  %v67_v11 = vld [vmem:[#allocation6 + $0x48] sm:$0xff]  ;;  %s3727_s23 = smov 96   ;;  %s3728_s24 = smov 80   ;;  %vm930_vm3 = vcmask 261248  }
  0x3a   :  { %v3450_v9 = vpack.c.bf16 %v68_v7, %v65_v6  ;;  %v71_v12 = vld [vmem:[#allocation6 + $0x68] sm:$0xff]  ;;  %3447 = vmatprep.subr.bf16.mxu0 %v3446_v4  ;;  %v74_v13 = vld [vmem:[#allocation6 + $0x80] sm:$0xff]  ;;  %v3452_v14 = vpack.c.bf16 %v67_v11, %v64_v10  ;;  %v73_v17 = vld [vmem:[#allocation6 + $0x78] sm:$0xff]  ;;  %s3729_s25 = smov 64   ;;  %s3730_s26 = smov 48   ;;  %vm1267_vm4 = vcmask 392448  }
  0x3b   :  { %3449 = vmatpush1.bf16.msra.mxu0 %v3448_v8  ;;  %v3454_v15 = vpack.c.bf16 %v74_v13, %v71_v12  ;;  %v70_v16 = vld [vmem:[#allocation6 + $0x60] sm:$0xff]  ;;  %v77_v18 = vld [vmem:[#allocation6 + $0x98] sm:$0xff]  ;;  %v80_v19 = vld [vmem:[#allocation6 + $0xb0] sm:$0xff]  ;;  %s3731_s27 = smov 32   ;;  %s3732_s28 = smov 16   ;;  %vm1604_vm5 = vcmask 523648  }
  0x3c   :  { %3451 = vmatprep.subr.bf16.mxu0 %v3450_v9  ;;  %v3456_v20 = vpack.c.bf16 %v73_v17, %v70_v16  ;;  %v3458_v21 = vpack.c.bf16 %v80_v19, %v77_v18  ;;  %v76_v22 = vld [vmem:[#allocation6 + $0x90] sm:$0xff]  ;;  %v79_v23 = vld [vmem:[#allocation6 + $0xa8] sm:$0xff]  ;;  %v86_v25 = vld [vmem:[#allocation6 + $0xe0] sm:$0xff]  ;;  %vm1941_vm6 = vcmask 654848   ;;  %vm2278_vm7 = vcmask 786048   ;;  %s3733_s29 = smov [#allocation9]  }
  0x3d   :  { %v83_v24 = vld [vmem:[#allocation6 + $0xc8] sm:$0xff]  ;;  %v56_v26 = vld [vmem:[#allocation3] sm:$0xff]  ;;  %v3460_v27 = vpack.c.bf16 %v79_v23, %v76_v22  ;;  %v82_v29 = vld [vmem:[#allocation6 + $0xc0] sm:$0xff]  ;;  %vm2615_vm8 = vcmask 917248   ;;  %vm2952_vm9 = vcmask 1048448   ;;  %s3039_s30 = sshll.u32 %s3733_s29, 4  ;;  %s3040_s30 = int_to_ptr.vmem [resolvable:$true] %s3039_s30 }
  0x3e   :  { %3248 = vmatprep.mubr.f32.mxu1 %v56_v26  ;;  %v3462_v28 = vpack.c.bf16 %v86_v25, %v83_v24  ;;  %v85_v30 = vld [vmem:[#allocation6 + $0xd8] sm:$0xff]  ;;  %v92_v32 = vld [vmem:[#allocation6 + $0x110] sm:$0xff]  ;;  %v91_v36 = vld [vmem:[#allocation6 + $0x108] sm:$0xff]  ;;  %s3689_s4 = scalar_lea.vmem %s3040_s30, 256  ;;  %p3694_p11 = scmp.lt.s32.totalorder %s3040_s30, %s3040_s30 }
  0x3f   :  { %3453 = vmatpush1.bf16.msra.mxu0 %v3452_v14  ;;  %v89_v31 = vld [vmem:[#allocation6 + $0xf8] sm:$0xff]  ;;  %v3464_v33 = vpack.c.bf16 %v85_v30, %v82_v29  ;;  %v88_v35 = vld [vmem:[#allocation6 + $0xf0] sm:$0xff]  ;;  %v95_v37 = vld [vmem:[#allocation6 + $0x128] sm:$0xff]  ;;  %p3690_p10 = scmp.ne.s32.totalorder %s3040_s30, %s3689_s4  ;;  %p3695_p12 = scmp.lt.s32.totalorder %s3689_s4, %s3689_s4 }
  0x40   :  { %3455 = vmatprep.subr.bf16.mxu0 %v3454_v15  ;;  %v3466_v34 = vpack.c.bf16 %v92_v32, %v89_v31  ;;  %v98_v38 = vld [vmem:[#allocation6 + $0x140] sm:$0xff]  ;;  %v3468_v39 = vpack.c.bf16 %v91_v36, %v88_v35  ;;  %v97_v42 = vld [vmem:[#allocation6 + $0x138] sm:$0xff]  ;;  %v104_v44 = vld [vmem:[#allocation6 + $0x170] sm:$0xff] }
  0x41   :  { %v3470_v40 = vpack.c.bf16 %v98_v38, %v95_v37  ;;  %v94_v41 = vld [vmem:[#allocation6 + $0x120] sm:$0xff]  ;;  %v101_v43 = vld [vmem:[#allocation6 + $0x158] sm:$0xff]  ;;  %v100_v47 = vld [vmem:[#allocation6 + $0x150] sm:$0xff]  ;;  %p3696_p13 = por %p3695_p12, %p3694_p11 }
  0x42   :  { %v3472_v45 = vpack.c.bf16 %v97_v42, %v94_v41  ;;  %v3474_v46 = vpack.c.bf16 %v104_v44, %v101_v43  ;;  %v103_v48 = vld [vmem:[#allocation6 + $0x168] sm:$0xff]  ;;  %v57_v50 = vld [vmem:[#allocation3 + $0x8] sm:$0xff]  ;;  %v60_v51 = vld [vmem:[#allocation6 + $0x10] sm:$0xff] }
  0x43   :  { %3457 = vmatpush1.bf16.msra.mxu0 %v3456_v20  ;;  %v3476_v49 = vpack.c.bf16 %v103_v48, %v100_v47  ;;  %v63_v52 = vld [vmem:[#allocation6 + $0x28] sm:$0xff]  ;;  %v66_v53 = vld [vmem:[#allocation6 + $0x40] sm:$0xff]  ;;  %v69_v55 = vld [vmem:[#allocation6 + $0x58] sm:$0xff]  ;;  %p3697_p0 = pnand %p3696_p13, %p3690_p10 }
  0x44   :  { %3459 = vmatprep.subr.bf16.mxu0 %v3458_v21  ;;  %v3478_v54 = vpack.c.bf16 %v63_v52, %v60_v51  ;;  %v3482_v56 = vpack.c.bf16 %v69_v55, %v66_v53  ;;  %v72_v57 = vld [vmem:[#allocation6 + $0x70] sm:$0xff]  ;;  %v75_v58 = vld [vmem:[#allocation6 + $0x88] sm:$0xff]  ;;  %v78_v62 = vld [vmem:[#allocation6 + $0xa0] sm:$0xff] }
  0x45   :  { %v3486_v61 = vpack.c.bf16 %v75_v58, %v72_v57  ;;  %v81_v63 = vld [vmem:[#allocation6 + $0xb8] sm:$0xff]  ;;  %v84_v4 = vld [vmem:[#allocation6 + $0xd0] sm:$0xff]  ;;  %v87_v5 = vld [vmem:[#allocation6 + $0xe8] sm:$0xff] }
  0x46   :  { %3479 = vmatprep.subr.bf16.mxu1 %v3478_v54  ;;  %v3490_v3 = vpack.c.bf16 %v81_v63, %v78_v62  ;;  %v3494_v6 = vpack.c.bf16 %v87_v5, %v84_v4  ;;  %v90_v7 = vld [vmem:[#allocation6 + $0x100] sm:$0xff]  ;;  %v93_v8 = vld [vmem:[#allocation6 + $0x118] sm:$0xff]  ;;  %v96_v10 = vld [vmem:[#allocation6 + $0x130] sm:$0xff] }
  0x47   :  { %3461 = vmatpush1.bf16.msra.mxu0 %v3460_v27  ;;  %3481 = vmatpush3.bf16.msra.mxu1 %v3478_v54  ;;  %v3498_v9 = vpack.c.bf16 %v93_v8, %v90_v7  ;;  %v99_v11 = vld [vmem:[#allocation6 + $0x148] sm:$0xff]  ;;  %v102_v13 = vld [vmem:[#allocation6 + $0x160] sm:$0xff]  ;;  %v105_v14 = vld [vmem:[#allocation6 + $0x178] sm:$0xff] }
  0x48   :  { %3463 = vmatprep.subr.bf16.mxu0 %v3462_v28  ;;  %3483 = vmatprep.subr.bf16.mxu1 %v3482_v56  ;;  %v3502_v12 = vpack.c.bf16 %v99_v11, %v96_v10  ;;  %v3506_v15 = vpack.c.bf16 %v105_v14, %v102_v13 }
  0x4b   :  { %3465 = vmatpush1.bf16.msra.mxu0 %v3464_v33  ;;  %3485 = vmatpush3.bf16.msra.mxu1 %v3482_v56 }
  0x4c   :  { %3467 = vmatprep.subr.bf16.mxu0 %v3466_v34  ;;  %3487 = vmatprep.subr.bf16.mxu1 %v3486_v61 }
  0x4f   :  { %3469 = vmatpush1.bf16.msra.mxu0 %v3468_v39  ;;  %3489 = vmatpush3.bf16.msra.mxu1 %v3486_v61 }
  0x50   :  { %3471 = vmatprep.subr.bf16.mxu0 %v3470_v40  ;;  %3491 = vmatprep.subr.bf16.mxu1 %v3490_v3 }
  0x53   :  { %3473 = vmatpush1.bf16.msra.mxu0 %v3472_v45  ;;  %3493 = vmatpush3.bf16.msra.mxu1 %v3490_v3 }
  0x54   :  { %3475 = vmatprep.subr.bf16.mxu0 %v3474_v46  ;;  %3495 = vmatprep.subr.bf16.mxu1 %v3494_v6 }
  0x57   :  { %3477 = vmatpush1.bf16.msra.mxu0 %v3476_v49  ;;  %3497 = vmatpush3.bf16.msra.mxu1 %v3494_v6 }
  0x58   :  { %3251 = vmatprep.subr.mxu0 %v3724_v0  ;;  %3499 = vmatprep.subr.bf16.mxu1 %v3498_v9 }
  0x5a   :  { %187 = vmatmul.mubr.f32.vlgmr.msra.gmra.mrb[0].mxu0 %v56_v26 }
  0x5b   :  { %192 = vmatprep.mubr.f32.mxu0 %v3724_v0  ;;  %3501 = vmatpush3.bf16.msra.mxu1 %v3498_v9 }
  0x5c   :  { %3503 = vmatprep.subr.bf16.mxu1 %v3502_v12 }
  0x5e   :  { %193 = vmatmul.mubr.f32.gmra.mrb[2].mxu0 %v57_v50 }
  0x5f   :  { %3253 = vmatprep.mubr.msk.f32.mxu0 %vm3725_vm0, %v3724_v0  ;;  %3505 = vmatpush3.bf16.msra.mxu1 %v3502_v12 }
  0x60   :  { %3507 = vmatprep.subr.bf16.mxu1 %v3506_v15 }
  0x63   :  { %3509 = vmatpush3.bf16.msra.mxu1 %v3506_v15 }
  0x64   :  { %3281 = vmatprep.subr.mxu1 %v3724_v0 }
  0x66   :  { %3249 = vmatmul.mubr.f32.vlgmr.msra.gmra.mrb[0].mxu1 %v57_v50 }
  0x67   :  { %3283 = vmatprep.mubr.msk.f32.mxu1 %vm3725_vm0, %v3724_v0 }
 0x12d   :  { %v3801_v59 = vpop.f32.mrb[0].mxu0 }
 0x12e   :  { %v3803_v60 = vpop.f32.mrb[1].mxu0 }
 0x12f   :  { %596 = vrot.lane.b32.xlu1 %v3803_v60, %s3726_s2  ;;  %3252 = vmatpush3.xpose.msk.msra.mxu0 %vm274_vm1, %v3803_v60 }
 0x130   :  { %3256 = vmatprep.subr.mxu0 %v3724_v0 }
 0x131   :  { %v3810_v1 = vpop.f32.mrb[2].mxu0 }
 0x132   :  { %v3812_v2 = vpop.f32.mrb[3].mxu0  ;;  %3254 = vmatmul.mubr.msk.f32.vlgmr.msra.gmra.mrb[4].mxu0 %vm274_vm1, %v3801_v59 }
 0x133   :  { %594 = vrot.lane.b32.xlu1 %v3801_v59, %s3726_s2  ;;  %3257 = vmatpush3.xpose.msk.msra.mxu0 %vm274_vm1, %v3812_v2 }
 0x134   :  { %3258 = vmatprep.mubr.msk.f32.mxu0 %vm3725_vm0, %v3724_v0  ;;  %3261 = vmatprep.subr.mxu0 %v3724_v0 }
 0x136   :  { %3259 = vmatmul.mubr.msk.f32.vlgmr.msra.gmra.mrb[6].mxu0 %vm274_vm1, %v3810_v1 }
 0x137   :  { %672 = vrot.lane.b32.xlu1 %v3810_v1, %s3726_s2  ;;  %3263 = vmatprep.mubr.msk.f32.mxu0 %vm3725_vm0, %v3724_v0 }
 0x139   :  { %v3834_v28 = vpop.f32.mrb[0].mxu1 }
 0x13a   :  { %v3836_v29 = vpop.f32.mrb[1].mxu1 }
 0x13b   :  { %3262 = vmatpush3.msra.mxu0 %v3836_v29  ;;  %769 = vrot.lane.b32.xlu1 %v3836_v29, %s3726_s2 }
 0x13c   :  { %3266 = vmatprep.subr.mxu0 %v3724_v0 }
 0x1a1   :  { %v597_v30 = vpop.permute.xlu1 %596 }
 0x1a5   :  { %v595_v31 = vpop.permute.xlu1 %594 }
 0x1a9   :  { %v673_v32 = vpop.permute.xlu1 %672 }
 0x1ad   :  { %v770_v33 = vpop.permute.xlu1 %769 }
 0x1ae   :  { %3282 = vmatpush3.msra.mxu1 %v770_v33 }
 0x1af   :  { %3291 = vmatprep.subr.mxu1 %v3724_v0 }
 0x205   :  { %v347_v16 = vpop.f32.mrb[4].mxu0 }
 0x206   :  { %v3056_v17 = vclamps-f32 %v347_v16, 5.0  ;;  %v3255_v18 = vpop.f32.mrb[5].mxu0 }
 0x208   :  { %v431_v19 = vmul.f32 1.442695, %v3056_v17 }
 0x209   :  { %v423_v20 = vpop.f32.mrb[6].mxu0 }
 0x20a   :  { %3559 = vpow2.f32 %v431_v19  ;;  %v3057_v21 = vclamps-f32 %v423_v20, 5.0  ;;  %v3260_v22 = vpop.f32.mrb[7].mxu0 }
 0x20c   :  { %v433_v23 = vmul.f32 1.442695, %v3057_v21 }
 0x20e   :  { %3561 = vpow2.f32 %v433_v23 }
 0x214   :  { %v3560_v24 = vpop.eup %3559 }
 0x215   :  { %v436_v25 = vsel %vm435_vm2, %v3560_v24, 0.0 }
 0x216   :  { %437 = vadd.xlane.f32.xlu0 %v436_v25 }
 0x218   :  { %v3562_v26 = vpop.eup %3561 }
 0x219   :  { %v439_v27 = vsel %vm435_vm2, %v3562_v26, 0.0 }
 0x21a   :  { %440 = vadd.xlane.f32.xlu0 %v439_v27 }
 0x230   :  { %674 = vrot.lane.b32.xlu0 %v3812_v2, %s3726_s2 }
 0x2a3   :  { %v438_v34 = vpop.xlane.xlu0 %437 }
 0x2a4   :  { %3563 = vrcp.f32 %v438_v34 }
 0x2a7   :  { %v441_v35 = vpop.xlane.xlu0 %440 }
 0x2a8   :  { %3565 = vrcp.f32 %v441_v35 }
 0x2ab   :  { %v675_v40 = vpop.permute.xlu0 %674 }
 0x2ae   :  { %v3564_v36 = vpop.eup %3563 }
 0x2af   :  { %v444_v37 = vmul.f32 %v3564_v36, %v3560_v24 }
 0x2b1   :  { %3264 = vmatmul.mubr.msk.f32.vlgmr.msra.gmra.mrb[8].mxu0 %vm435_vm2, %v444_v37 }
 0x2b2   :  { %v3566_v38 = vpop.eup %3565  ;;  %3267 = vmatpush3.msra.mxu0 %v3834_v28  ;;  %3268 = vmatprep.mubr.msk.f32.mxu0 %vm3725_vm0, %v3724_v0 }
 0x2b3   :  { %v445_v39 = vmul.f32 %v3566_v38, %v3562_v26  ;;  %3271 = vmatprep.subr.mxu0 %v3724_v0 }
 0x2b5   :  { %3269 = vmatmul.mubr.msk.f32.vlgmr.msra.gmra.mrb[10].mxu0 %vm435_vm2, %v445_v39 }
 0x2b6   :  { %3273 = vmatprep.mubr.msk.f32.mxu0 %vm3725_vm0, %v3724_v0 }
 0x2b9   :  { %3272 = vmatpush3.xpose.msk.msra.mxu0 %vm274_vm1, %v597_v30 }
 0x2ba   :  { %3276 = vmatprep.subr.mxu0 %v3724_v0 }
 0x2bc   :  { %3274 = vmatmul.mubr.msk.f32.vlgmr.msra.gmra.mrb[12].mxu0 %vm274_vm1, %v595_v31 }
 0x2bd   :  { %3277 = vmatpush3.xpose.msk.msra.mxu0 %vm274_vm1, %v675_v40  ;;  %3278 = vmatprep.mubr.msk.f32.mxu0 %vm3725_vm0, %v3724_v0 }
 0x2be   :  { %3286 = vmatprep.subr.mxu0 %v3724_v0 }
 0x2c0   :  { %3279 = vmatmul.mubr.msk.f32.vlgmr.msra.gmra.mrb[14].mxu0 %vm274_vm1, %v673_v32 }
 0x2c1   :  { %3288 = vmatprep.mubr.msk.f32.mxu0 %vm3725_vm0, %v3724_v0 }
 0x384   :  { %v515_v41 = vpop.f32.mrb[8].mxu0 }
 0x385   :  { %592 = vst.msk [vmem:[#allocation2] sm:$0xff] %vm274_vm1, %v515_v41  ;;  %v3265_v42 = vpop.f32.mrb[9].mxu0 }
 0x388   :  { %v588_v43 = vpop.f32.mrb[10].mxu0 }
 0x389   :  { %593 = vst.msk [vmem:[#allocation2 + $0x8] sm:$0xff] %vm274_vm1, %v588_v43  ;;  %v3270_v44 = vpop.f32.mrb[11].mxu0 }
 0x38f   :  { %v668_v45 = vpop.f32.mrb[12].mxu0 }
 0x390   :  { %v3064_v46 = vclamps-f32 %v668_v45, 5.0  ;;  %v3275_v47 = vpop.f32.mrb[13].mxu0 }
 0x392   :  { %v754_v48 = vmul.f32 1.442695, %v3064_v46 }
 0x393   :  { %v746_v49 = vpop.f32.mrb[14].mxu0 }
 0x394   :  { %3567 = vpow2.f32 %v754_v48  ;;  %v3065_v50 = vclamps-f32 %v746_v49, 5.0  ;;  %v3280_v51 = vpop.f32.mrb[15].mxu0 }
 0x396   :  { %v756_v52 = vmul.f32 1.442695, %v3065_v50 }
 0x398   :  { %3569 = vpow2.f32 %v756_v52 }
 0x39e   :  { %v3568_v53 = vpop.eup %3567 }
 0x39f   :  { %v758_v54 = vsel %vm435_vm2, %v3568_v53, 0.0 }
 0x3a0   :  { %759 = vadd.xlane.f32.xlu1 %v758_v54 }
 0x3a2   :  { %v3570_v55 = vpop.eup %3569 }
 0x3a3   :  { %v761_v56 = vsel %vm435_vm2, %v3570_v55, 0.0 }
 0x3a4   :  { %762 = vadd.xlane.f32.xlu0 %v761_v56 }
 0x3b1   :  { %935 = vrot.lane.b32.xlu1 %v3803_v60, %s3727_s23 }
 0x3b5   :  { %1013 = vrot.lane.b32.xlu1 %v3812_v2, %s3727_s23 }
 0x3b9   :  { %933 = vrot.lane.b32.xlu1 %v3801_v59, %s3727_s23 }
 0x3ba   :  { %846 = vrot.lane.b32.xlu0 %v3834_v28, %s3726_s2 }
 0x3bd   :  { %1011 = vrot.lane.b32.xlu1 %v3810_v1, %s3727_s23 }
 0x3be   :  { %1107 = vrot.lane.b32.xlu0 %v3836_v29, %s3727_s23 }
 0x3c1   :  { %1183 = vrot.lane.b32.xlu1 %v3834_v28, %s3727_s23 }
 0x3c2   :  { %1350 = vrot.lane.b32.xlu0 %v3812_v2, %s3728_s24 }
 0x3c5   :  { %1272 = vrot.lane.b32.xlu1 %v3803_v60, %s3728_s24 }
 0x42d   :  { %v760_v57 = vpop.xlane.xlu1 %759 }
 0x42e   :  { %3571 = vrcp.f32 %v760_v57 }
 0x431   :  { %v936_v58 = vpop.permute.xlu1 %935  ;;  %v763_v61 = vpop.xlane.xlu0 %762 }
 0x432   :  { %3573 = vrcp.f32 %v763_v61 }
 0x435   :  { %v1014_v62 = vpop.permute.xlu1 %1013  ;;  %v847_v63 = vpop.permute.xlu0 %846 }
 0x436   :  { %3287 = vmatpush3.msra.mxu0 %v847_v63 }
 0x437   :  { %3296 = vmatprep.subr.mxu0 %v3724_v0 }
 0x438   :  { %v3572_v3 = vpop.eup %3571 }
 0x439   :  { %v766_v4 = vmul.f32 %v3572_v3, %v3568_v53  ;;  %v934_v5 = vpop.permute.xlu1 %933  ;;  %v1108_v9 = vpop.permute.xlu0 %1107 }
 0x43b   :  { %3284 = vmatmul.mubr.msk.f32.vlgmr.msra.gmra.mrb[2].mxu1 %vm435_vm2, %v766_v4 }
 0x43c   :  { %v3574_v6 = vpop.eup %3573  ;;  %3292 = vmatpush3.xpose.msk.msra.mxu1 %vm274_vm1, %v936_v58  ;;  %3293 = vmatprep.mubr.msk.f32.mxu1 %vm3725_vm0, %v3724_v0 }
 0x43d   :  { %v767_v7 = vmul.f32 %v3574_v6, %v3570_v55  ;;  %v1012_v8 = vpop.permute.xlu1 %1011  ;;  %3301 = vmatprep.subr.mxu1 %v3724_v0  ;;  %v1351_v30 = vpop.permute.xlu0 %1350 }
 0x43f   :  { %3289 = vmatmul.mubr.msk.f32.vlgmr.msra.gmra.mrb[16].mxu0 %vm435_vm2, %v767_v7  ;;  %3294 = vmatmul.mubr.msk.f32.vlgmr.msra.gmra.mrb[4].mxu1 %vm274_vm1, %v934_v5 }
 0x440   :  { %3297 = vmatpush3.xpose.msk.msra.mxu0 %vm274_vm1, %v1014_v62  ;;  %3302 = vmatpush3.msra.mxu1 %v1108_v9 }
 0x441   :  { %v1184_v10 = vpop.permute.xlu1 %1183  ;;  %3298 = vmatprep.mubr.msk.f32.mxu0 %vm3725_vm0, %v3724_v0  ;;  %3306 = vmatprep.subr.mxu0 %v3724_v0 }
 0x442   :  { %3303 = vmatprep.mubr.msk.f32.mxu1 %vm3725_vm0, %v3724_v0  ;;  %3311 = vmatprep.subr.mxu1 %v3724_v0 }
 0x443   :  { %3299 = vmatmul.mubr.msk.f32.vlgmr.msra.gmra.mrb[18].mxu0 %vm274_vm1, %v1012_v8 }
 0x444   :  { %3307 = vmatpush3.msra.mxu0 %v1184_v10  ;;  %3308 = vmatprep.mubr.msk.f32.mxu0 %vm3725_vm0, %v3724_v0 }
 0x445   :  { %3316 = vmatprep.subr.mxu0 %v3724_v0  ;;  %v1273_v27 = vpop.permute.xlu1 %1272 }
 0x50e   :  { %v3904_v11 = vpop.f32.mrb[2].mxu1 }
 0x50f   :  { %v3285_v12 = vpop.f32.mrb[3].mxu1 }
 0x512   :  { %v3906_v13 = vpop.f32.mrb[16].mxu0  ;;  %v1007_v14 = vpop.f32.mrb[4].mxu1 }
 0x513   :  { %v3072_v15 = vclamps-f32 %v1007_v14, 5.0  ;;  %v3290_v16 = vpop.f32.mrb[17].mxu0  ;;  %v3295_v17 = vpop.f32.mrb[5].mxu1 }
 0x515   :  { %v1093_v18 = vmul.f32 1.442695, %v3072_v15 }
 0x516   :  { %v1085_v19 = vpop.f32.mrb[18].mxu0 }
 0x517   :  { %3575 = vpow2.f32 %v1093_v18  ;;  %v3073_v20 = vclamps-f32 %v1085_v19, 5.0  ;;  %v3300_v21 = vpop.f32.mrb[19].mxu0 }
 0x519   :  { %v1095_v22 = vmul.f32 1.442695, %v3073_v20 }
 0x51b   :  { %3577 = vpow2.f32 %v1095_v22 }
 0x521   :  { %v3576_v23 = vpop.eup %3575 }
 0x522   :  { %v1097_v24 = vsel %vm435_vm2, %v3576_v23, 0.0 }
 0x523   :  { %1098 = vadd.xlane.f32.xlu1 %v1097_v24 }
 0x525   :  { %v3578_v25 = vpop.eup %3577 }
 0x526   :  { %v1100_v26 = vsel %vm435_vm2, %v3578_v25, 0.0 }
 0x527   :  { %1101 = vadd.xlane.f32.xlu0 %v1100_v26 }
 0x534   :  { %1270 = vrot.lane.b32.xlu1 %v3801_v59, %s3728_s24 }
 0x538   :  { %1520 = vrot.lane.b32.xlu1 %v3834_v28, %s3728_s24 }
 0x53c   :  { %1609 = vrot.lane.b32.xlu1 %v3803_v60, %s3729_s25 }
 0x53d   :  { %1348 = vrot.lane.b32.xlu0 %v3810_v1, %s3728_s24 }
 0x541   :  { %1444 = vrot.lane.b32.xlu0 %v3836_v29, %s3728_s24 }
 0x545   :  { %1687 = vrot.lane.b32.xlu0 %v3812_v2, %s3729_s25 }
 0x5b0   :  { %v1099_v31 = vpop.xlane.xlu1 %1098 }
 0x5b1   :  { %3579 = vrcp.f32 %v1099_v31 }
 0x5b4   :  { %v1102_v32 = vpop.xlane.xlu0 %1101  ;;  %v1271_v37 = vpop.permute.xlu1 %1270 }
 0x5b5   :  { %3581 = vrcp.f32 %v1102_v32 }
 0x5b8   :  { %v1349_v35 = vpop.permute.xlu0 %1348  ;;  %v1521_v40 = vpop.permute.xlu1 %1520 }
 0x5bb   :  { %v3580_v33 = vpop.eup %3579 }
 0x5bc   :  { %v1105_v34 = vmul.f32 %v3580_v33, %v3576_v23  ;;  %v1445_v39 = vpop.permute.xlu0 %1444  ;;  %v1610_v57 = vpop.permute.xlu1 %1609 }
 0x5be   :  { %3304 = vmatmul.mubr.msk.f32.vlgmr.msra.gmra.mrb[6].mxu1 %vm435_vm2, %v1105_v34 }
 0x5bf   :  { %v3582_v36 = vpop.eup %3581  ;;  %3312 = vmatpush3.xpose.msk.msra.mxu1 %vm274_vm1, %v1273_v27  ;;  %3313 = vmatprep.mubr.msk.f32.mxu1 %vm3725_vm0, %v3724_v0 }
 0x5c0   :  { %v1106_v38 = vmul.f32 %v3582_v36, %v3578_v25  ;;  %3321 = vmatprep.subr.mxu1 %v3724_v0  ;;  %v1688_v58 = vpop.permute.xlu0 %1687 }
 0x5c2   :  { %3309 = vmatmul.mubr.msk.f32.vlgmr.msra.gmra.mrb[20].mxu0 %vm435_vm2, %v1106_v38  ;;  %3314 = vmatmul.mubr.msk.f32.vlgmr.msra.gmra.mrb[8].mxu1 %vm274_vm1, %v1271_v37 }
 0x5c3   :  { %3317 = vmatpush3.xpose.msk.msra.mxu0 %vm274_vm1, %v1351_v30  ;;  %3322 = vmatpush3.msra.mxu1 %v1445_v39 }
 0x5c4   :  { %3318 = vmatprep.mubr.msk.f32.mxu0 %vm3725_vm0, %v3724_v0  ;;  %3326 = vmatprep.subr.mxu0 %v3724_v0 }
 0x5c5   :  { %3323 = vmatprep.mubr.msk.f32.mxu1 %vm3725_vm0, %v3724_v0  ;;  %3331 = vmatprep.subr.mxu1 %v3724_v0 }
 0x5c6   :  { %3319 = vmatmul.mubr.msk.f32.vlgmr.msra.gmra.mrb[22].mxu0 %vm274_vm1, %v1349_v35 }
 0x5c7   :  { %3327 = vmatpush3.msra.mxu0 %v1521_v40  ;;  %3328 = vmatprep.mubr.msk.f32.mxu0 %vm3725_vm0, %v3724_v0 }
 0x5c8   :  { %3336 = vmatprep.subr.mxu0 %v3724_v0 }
 0x691   :  { %v3940_v41 = vpop.f32.mrb[6].mxu1 }
 0x692   :  { %v3305_v42 = vpop.f32.mrb[7].mxu1 }
 0x695   :  { %v3942_v43 = vpop.f32.mrb[20].mxu0  ;;  %v1344_v44 = vpop.f32.mrb[8].mxu1 }
 0x696   :  { %v3080_v45 = vclamps-f32 %v1344_v44, 5.0  ;;  %v3310_v46 = vpop.f32.mrb[21].mxu0  ;;  %v3315_v47 = vpop.f32.mrb[9].mxu1 }
 0x698   :  { %v1430_v48 = vmul.f32 1.442695, %v3080_v45 }
 0x699   :  { %v1422_v49 = vpop.f32.mrb[22].mxu0 }
 0x69a   :  { %3583 = vpow2.f32 %v1430_v48  ;;  %v3081_v50 = vclamps-f32 %v1422_v49, 5.0  ;;  %v3320_v51 = vpop.f32.mrb[23].mxu0 }
 0x69c   :  { %v1432_v52 = vmul.f32 1.442695, %v3081_v50 }
 0x69e   :  { %3585 = vpow2.f32 %v1432_v52 }
 0x6a4   :  { %v3584_v53 = vpop.eup %3583 }
 0x6a5   :  { %v1434_v54 = vsel %vm435_vm2, %v3584_v53, 0.0 }
 0x6a6   :  { %1435 = vadd.xlane.f32.xlu1 %v1434_v54 }
 0x6a8   :  { %v3586_v55 = vpop.eup %3585 }
 0x6a9   :  { %v1437_v56 = vsel %vm435_vm2, %v3586_v55, 0.0 }
 0x6aa   :  { %1438 = vadd.xlane.f32.xlu0 %v1437_v56 }
 0x6b7   :  { %1607 = vrot.lane.b32.xlu1 %v3801_v59, %s3729_s25 }
 0x6bb   :  { %1857 = vrot.lane.b32.xlu1 %v3834_v28, %s3729_s25 }
 0x6bf   :  { %1946 = vrot.lane.b32.xlu1 %v3803_v60, %s3730_s26 }
 0x6c0   :  { %1685 = vrot.lane.b32.xlu0 %v3810_v1, %s3729_s25 }
 0x6c4   :  { %1781 = vrot.lane.b32.xlu0 %v3836_v29, %s3729_s25 }
 0x6c8   :  { %2024 = vrot.lane.b32.xlu0 %v3812_v2, %s3730_s26 }
 0x733   :  { %v1436_v61 = vpop.xlane.xlu1 %1435 }
 0x734   :  { %3587 = vrcp.f32 %v1436_v61 }
 0x737   :  { %v1439_v62 = vpop.xlane.xlu0 %1438  ;;  %v1608_v6 = vpop.permute.xlu1 %1607 }
 0x738   :  { %3589 = vrcp.f32 %v1439_v62 }
 0x73b   :  { %v1686_v4 = vpop.permute.xlu0 %1685  ;;  %v1858_v9 = vpop.permute.xlu1 %1857 }
 0x73e   :  { %v3588_v63 = vpop.eup %3587 }
 0x73f   :  { %v1442_v3 = vmul.f32 %v3588_v63, %v3584_v53  ;;  %v1782_v8 = vpop.permute.xlu0 %1781  ;;  %v1947_v30 = vpop.permute.xlu1 %1946 }
 0x741   :  { %3324 = vmatmul.mubr.msk.f32.vlgmr.msra.gmra.mrb[10].mxu1 %vm435_vm2, %v1442_v3 }
 0x742   :  { %v3590_v5 = vpop.eup %3589  ;;  %3332 = vmatpush3.xpose.msk.msra.mxu1 %vm274_vm1, %v1610_v57  ;;  %3333 = vmatprep.mubr.msk.f32.mxu1 %vm3725_vm0, %v3724_v0 }
 0x743   :  { %v1443_v7 = vmul.f32 %v3590_v5, %v3586_v55  ;;  %3341 = vmatprep.subr.mxu1 %v3724_v0  ;;  %v2025_v31 = vpop.permute.xlu0 %2024 }
 0x745   :  { %3329 = vmatmul.mubr.msk.f32.vlgmr.msra.gmra.mrb[24].mxu0 %vm435_vm2, %v1443_v7  ;;  %3334 = vmatmul.mubr.msk.f32.vlgmr.msra.gmra.mrb[12].mxu1 %vm274_vm1, %v1608_v6 }
 0x746   :  { %3337 = vmatpush3.xpose.msk.msra.mxu0 %vm274_vm1, %v1688_v58  ;;  %3342 = vmatpush3.msra.mxu1 %v1782_v8 }
 0x747   :  { %3338 = vmatprep.mubr.msk.f32.mxu0 %vm3725_vm0, %v3724_v0  ;;  %3346 = vmatprep.subr.mxu0 %v3724_v0 }
 0x748   :  { %3343 = vmatprep.mubr.msk.f32.mxu1 %vm3725_vm0, %v3724_v0  ;;  %3351 = vmatprep.subr.mxu1 %v3724_v0 }
 0x749   :  { %3339 = vmatmul.mubr.msk.f32.vlgmr.msra.gmra.mrb[26].mxu0 %vm274_vm1, %v1686_v4 }
 0x74a   :  { %3347 = vmatpush3.msra.mxu0 %v1858_v9  ;;  %3348 = vmatprep.mubr.msk.f32.mxu0 %vm3725_vm0, %v3724_v0 }
 0x74b   :  { %3356 = vmatprep.subr.mxu0 %v3724_v0 }
 0x814   :  { %v3976_v10 = vpop.f32.mrb[10].mxu1 }
 0x815   :  { %v3325_v12 = vpop.f32.mrb[11].mxu1 }
 0x818   :  { %v3978_v14 = vpop.f32.mrb[24].mxu0  ;;  %v1681_v15 = vpop.f32.mrb[12].mxu1 }
 0x819   :  { %v3088_v16 = vclamps-f32 %v1681_v15, 5.0  ;;  %v3330_v17 = vpop.f32.mrb[25].mxu0  ;;  %v3335_v18 = vpop.f32.mrb[13].mxu1 }
 0x81b   :  { %v1767_v19 = vmul.f32 1.442695, %v3088_v16 }
 0x81c   :  { %v1759_v20 = vpop.f32.mrb[26].mxu0 }
 0x81d   :  { %3591 = vpow2.f32 %v1767_v19  ;;  %v3089_v21 = vclamps-f32 %v1759_v20, 5.0  ;;  %v3340_v22 = vpop.f32.mrb[27].mxu0 }
 0x81f   :  { %v1769_v23 = vmul.f32 1.442695, %v3089_v21 }
 0x821   :  { %3593 = vpow2.f32 %v1769_v23 }
 0x827   :  { %v3592_v24 = vpop.eup %3591 }
 0x828   :  { %v1771_v25 = vsel %vm435_vm2, %v3592_v24, 0.0 }
 0x829   :  { %1772 = vadd.xlane.f32.xlu1 %v1771_v25 }
 0x82b   :  { %v3594_v26 = vpop.eup %3593 }
 0x82c   :  { %v1774_v27 = vsel %vm435_vm2, %v3594_v26, 0.0 }
 0x82d   :  { %1775 = vadd.xlane.f32.xlu0 %v1774_v27 }
 0x83a   :  { %1944 = vrot.lane.b32.xlu1 %v3801_v59, %s3730_s26 }
 0x83e   :  { %2194 = vrot.lane.b32.xlu1 %v3834_v28, %s3730_s26 }
 0x842   :  { %2283 = vrot.lane.b32.xlu1 %v3803_v60, %s3731_s27 }
 0x843   :  { %2022 = vrot.lane.b32.xlu0 %v3810_v1, %s3730_s26 }
 0x847   :  { %2118 = vrot.lane.b32.xlu0 %v3836_v29, %s3730_s26 }
 0x84b   :  { %2361 = vrot.lane.b32.xlu0 %v3812_v2, %s3731_s27 }
 0x8b6   :  { %v1773_v32 = vpop.xlane.xlu1 %1772 }
 0x8b7   :  { %3595 = vrcp.f32 %v1773_v32 }
 0x8ba   :  { %v1776_v33 = vpop.xlane.xlu0 %1775  ;;  %v1945_v38 = vpop.permute.xlu1 %1944 }
 0x8bb   :  { %3597 = vrcp.f32 %v1776_v33 }
 0x8be   :  { %v2023_v36 = vpop.permute.xlu0 %2022  ;;  %v2195_v42 = vpop.permute.xlu1 %2194 }
 0x8c1   :  { %v3596_v34 = vpop.eup %3595 }
 0x8c2   :  { %v1779_v35 = vmul.f32 %v3596_v34, %v3592_v24  ;;  %v2119_v40 = vpop.permute.xlu0 %2118  ;;  %v2284_v62 = vpop.permute.xlu1 %2283 }
 0x8c4   :  { %3344 = vmatmul.mubr.msk.f32.vlgmr.msra.gmra.mrb[14].mxu1 %vm435_vm2, %v1779_v35 }
 0x8c5   :  { %v3598_v37 = vpop.eup %3597  ;;  %3352 = vmatpush3.xpose.msk.msra.mxu1 %vm274_vm1, %v1947_v30  ;;  %3353 = vmatprep.mubr.msk.f32.mxu1 %vm3725_vm0, %v3724_v0 }
 0x8c6   :  { %v1780_v39 = vmul.f32 %v3598_v37, %v3594_v26  ;;  %3361 = vmatprep.subr.mxu1 %v3724_v0  ;;  %v2362_v63 = vpop.permute.xlu0 %2361 }
 0x8c8   :  { %3349 = vmatmul.mubr.msk.f32.vlgmr.msra.gmra.mrb[28].mxu0 %vm435_vm2, %v1780_v39  ;;  %3354 = vmatmul.mubr.msk.f32.vlgmr.msra.gmra.mrb[16].mxu1 %vm274_vm1, %v1945_v38 }
 0x8c9   :  { %3357 = vmatpush3.xpose.msk.msra.mxu0 %vm274_vm1, %v2025_v31  ;;  %3362 = vmatpush3.msra.mxu1 %v2119_v40 }
 0x8ca   :  { %3358 = vmatprep.mubr.msk.f32.mxu0 %vm3725_vm0, %v3724_v0  ;;  %3366 = vmatprep.subr.mxu0 %v3724_v0 }
 0x8cb   :  { %3363 = vmatprep.mubr.msk.f32.mxu1 %vm3725_vm0, %v3724_v0  ;;  %3371 = vmatprep.subr.mxu1 %v3724_v0 }
 0x8cc   :  { %3359 = vmatmul.mubr.msk.f32.vlgmr.msra.gmra.mrb[30].mxu0 %vm274_vm1, %v2023_v36 }
 0x8cd   :  { %3367 = vmatpush3.msra.mxu0 %v2195_v42  ;;  %3368 = vmatprep.mubr.msk.f32.mxu0 %vm3725_vm0, %v3724_v0 }
 0x8ce   :  { %3376 = vmatprep.subr.mxu0 %v3724_v0 }
 0x997   :  { %v4012_v44 = vpop.f32.mrb[14].mxu1 }
 0x998   :  { %v3345_v45 = vpop.f32.mrb[15].mxu1 }
 0x99b   :  { %v4014_v46 = vpop.f32.mrb[28].mxu0  ;;  %v2018_v47 = vpop.f32.mrb[16].mxu1 }
 0x99c   :  { %v3096_v48 = vclamps-f32 %v2018_v47, 5.0  ;;  %v3350_v49 = vpop.f32.mrb[29].mxu0  ;;  %v3355_v50 = vpop.f32.mrb[17].mxu1 }
 0x99e   :  { %v2104_v51 = vmul.f32 1.442695, %v3096_v48 }
 0x99f   :  { %v2096_v52 = vpop.f32.mrb[30].mxu0 }
 0x9a0   :  { %3599 = vpow2.f32 %v2104_v51  ;;  %v3097_v53 = vclamps-f32 %v2096_v52, 5.0  ;;  %v3360_v54 = vpop.f32.mrb[31].mxu0 }
 0x9a2   :  { %v2106_v55 = vmul.f32 1.442695, %v3097_v53 }
 0x9a4   :  { %3601 = vpow2.f32 %v2106_v55 }
 0x9aa   :  { %v3600_v56 = vpop.eup %3599 }
 0x9ab   :  { %v2108_v57 = vsel %vm435_vm2, %v3600_v56, 0.0 }
 0x9ac   :  { %2109 = vadd.xlane.f32.xlu1 %v2108_v57 }
 0x9ae   :  { %v3602_v58 = vpop.eup %3601 }
 0x9af   :  { %v2111_v61 = vsel %vm435_vm2, %v3602_v58, 0.0 }
 0x9b0   :  { %2112 = vadd.xlane.f32.xlu0 %v2111_v61 }
 0x9bd   :  { %2281 = vrot.lane.b32.xlu1 %v3801_v59, %s3731_s27 }
 0x9c1   :  { %2531 = vrot.lane.b32.xlu1 %v3834_v28, %s3731_s27 }
 0x9c5   :  { %2620 = vrot.lane.b32.xlu1 %v3803_v60, %s3732_s28 }
 0x9c6   :  { %2359 = vrot.lane.b32.xlu0 %v3810_v1, %s3731_s27 }
 0x9ca   :  { %2455 = vrot.lane.b32.xlu0 %v3836_v29, %s3731_s27 }
 0x9ce   :  { %2698 = vrot.lane.b32.xlu0 %v3812_v2, %s3732_s28 }
 0xa39   :  { %v2110_v3 = vpop.xlane.xlu1 %2109 }
 0xa3a   :  { %3603 = vrcp.f32 %v2110_v3 }
 0xa3d   :  { %v2113_v4 = vpop.xlane.xlu0 %2112  ;;  %v2282_v8 = vpop.permute.xlu1 %2281 }
 0xa3e   :  { %3605 = vrcp.f32 %v2113_v4 }
 0xa41   :  { %v2360_v7 = vpop.permute.xlu0 %2359  ;;  %v2532_v12 = vpop.permute.xlu1 %2531 }
 0xa44   :  { %v3604_v5 = vpop.eup %3603 }
 0xa45   :  { %v2116_v6 = vmul.f32 %v3604_v5, %v3600_v56  ;;  %v2456_v2 = vpop.permute.xlu0 %2455  ;;  %v2621_v33 = vpop.permute.xlu1 %2620 }
 0xa47   :  { %3364 = vmatmul.mubr.msk.f32.vlgmr.msra.gmra.mrb[18].mxu1 %vm435_vm2, %v2116_v6 }
 0xa48   :  { %v3606_v60 = vpop.eup %3605  ;;  %3372 = vmatpush3.xpose.msk.msra.mxu1 %vm274_vm1, %v2284_v62  ;;  %3373 = vmatprep.mubr.msk.f32.mxu1 %vm3725_vm0, %v3724_v0 }
 0xa49   :  { %v2117_v9 = vmul.f32 %v3606_v60, %v3602_v58  ;;  %3381 = vmatprep.subr.mxu1 %v3724_v0  ;;  %v2699_v34 = vpop.permute.xlu0 %2698 }
 0xa4b   :  { %3369 = vmatmul.mubr.msk.f32.vlgmr.msra.gmra.mrb[32].mxu0 %vm435_vm2, %v2117_v9  ;;  %3374 = vmatmul.mubr.msk.f32.vlgmr.msra.gmra.mrb[20].mxu1 %vm274_vm1, %v2282_v8 }
 0xa4c   :  { %3377 = vmatpush3.xpose.msk.msra.mxu0 %vm274_vm1, %v2362_v63  ;;  %3382 = vmatpush3.msra.mxu1 %v2456_v2  ;;  %v106_v2 = vld [vmem:[#allocation8] sm:$0xff] }
 0xa4d   :  { %3378 = vmatprep.mubr.msk.f32.mxu0 %vm3725_vm0, %v3724_v0  ;;  %3386 = vmatprep.subr.mxu0 %v3724_v0 }
 0xa4e   :  { %3383 = vmatprep.mubr.msk.f32.mxu1 %vm3725_vm0, %v3724_v0  ;;  %3391 = vmatprep.subr.mxu1 %v3724_v0 }
 0xa4f   :  { %3379 = vmatmul.mubr.msk.f32.vlgmr.msra.gmra.mrb[34].mxu0 %vm274_vm1, %v2360_v7 }
 0xa50   :  { %3387 = vmatpush3.msra.mxu0 %v2532_v12  ;;  %3388 = vmatprep.mubr.msk.f32.mxu0 %vm3725_vm0, %v3724_v0  ;;  %v107_v12 = vld [vmem:[#allocation8 + $0x8] sm:$0xff] }
 0xa51   :  { %3396 = vmatprep.subr.mxu0 %v3724_v0 }
 0xb1a   :  { %v4048_v15 = vpop.f32.mrb[18].mxu1 }
 0xb1b   :  { %v3365_v16 = vpop.f32.mrb[19].mxu1 }
 0xb1c   :  { %v3510_v16 = vpack.c.bf16 %v107_v12, %v106_v2 }
 0xb1e   :  { %v4050_v17 = vpop.f32.mrb[32].mxu0  ;;  %v2355_v18 = vpop.f32.mrb[20].mxu1 }
 0xb1f   :  { %v3104_v19 = vclamps-f32 %v2355_v18, 5.0  ;;  %v3370_v20 = vpop.f32.mrb[33].mxu0  ;;  %v3375_v21 = vpop.f32.mrb[21].mxu1 }
 0xb20   :  { %v111_v20 = vld [vmem:[#allocation8 + $0x28] sm:$0xff] }
 0xb21   :  { %v2441_v22 = vmul.f32 1.442695, %v3104_v19  ;;  %v110_v19 = vld [vmem:[#allocation8 + $0x20] sm:$0xff] }
 0xb22   :  { %v2433_v23 = vpop.f32.mrb[34].mxu0  ;;  %v3518_v21 = vpack.c.bf16 %v111_v20, %v110_v19 }
 0xb23   :  { %3607 = vpow2.f32 %v2441_v22  ;;  %v3105_v24 = vclamps-f32 %v2433_v23, 5.0  ;;  %v3380_v25 = vpop.f32.mrb[35].mxu0  ;;  %v112_v22 = vld [vmem:[#allocation8 + $0x30] sm:$0xff]  ;;  %v113_v23 = vld [vmem:[#allocation8 + $0x38] sm:$0xff] }
 0xb24   :  { %v114_v25 = vld [vmem:[#allocation8 + $0x40] sm:$0xff] }
 0xb25   :  { %v2443_v26 = vmul.f32 1.442695, %v3105_v24  ;;  %v3522_v24 = vpack.c.bf16 %v113_v23, %v112_v22 }
 0xb27   :  { %3609 = vpow2.f32 %v2443_v26  ;;  %v115_v26 = vld [vmem:[#allocation8 + $0x48] sm:$0xff] }
 0xb2d   :  { %v3608_v27 = vpop.eup %3607 }
 0xb2e   :  { %v2445_v30 = vsel %vm435_vm2, %v3608_v27, 0.0 }
 0xb2f   :  { %2446 = vadd.xlane.f32.xlu1 %v2445_v30  ;;  %v116_v30 = vld [vmem:[#allocation8 + $0x50] sm:$0xff] }
 0xb31   :  { %v3610_v31 = vpop.eup %3609 }
 0xb32   :  { %v2448_v32 = vsel %vm435_vm2, %v3610_v31, 0.0 }
 0xb33   :  { %2449 = vadd.xlane.f32.xlu0 %v2448_v32 }
 0xb40   :  { %2618 = vrot.lane.b32.xlu1 %v3801_v59, %s3732_s28 }
 0xb49   :  { %2696 = vrot.lane.b32.xlu0 %v3810_v1, %s3732_s28 }
 0xbbc   :  { %v2447_v35 = vpop.xlane.xlu1 %2446 }
 0xbbd   :  { %3611 = vrcp.f32 %v2447_v35 }
 0xbc0   :  { %v2450_v36 = vpop.xlane.xlu0 %2449  ;;  %v2619_v1 = vpop.permute.xlu1 %2618 }
 0xbc1   :  { %3613 = vrcp.f32 %v2450_v36  ;;  %v120_v36 = vld [vmem:[#allocation8 + $0x70] sm:$0xff] }
 0xbc4   :  { %v2697_v40 = vpop.permute.xlu0 %2696 }
 0xbc7   :  { %v3612_v37 = vpop.eup %3611 }
 0xbc8   :  { %v2453_v38 = vmul.f32 %v3612_v37, %v3608_v27  ;;  %v3526_v27 = vpack.c.bf16 %v115_v26, %v114_v25  ;;  %v121_v37 = vld [vmem:[#allocation8 + $0x78] sm:$0xff] }
 0xbca   :  { %3384 = vmatmul.mubr.msk.f32.vlgmr.msra.gmra.mrb[22].mxu1 %vm435_vm2, %v2453_v38  ;;  %v3538_v38 = vpack.c.bf16 %v121_v37, %v120_v36 }
 0xbcb   :  { %v3614_v39 = vpop.eup %3613  ;;  %3392 = vmatpush3.xpose.msk.msra.mxu1 %vm274_vm1, %v2621_v33  ;;  %3393 = vmatprep.mubr.msk.f32.mxu1 %vm3725_vm0, %v3724_v0  ;;  %v118_v33 = vld [vmem:[#allocation8 + $0x60] sm:$0xff] }
 0xbcc   :  { %v2454_v59 = vmul.f32 %v3614_v39, %v3610_v31  ;;  %3401 = vmatprep.subr.mxu1 %v3724_v0  ;;  %v117_v31 = vld [vmem:[#allocation8 + $0x58] sm:$0xff] }
 0xbcd   :  { %v3530_v32 = vpack.c.bf16 %v117_v31, %v116_v30 }
 0xbce   :  { %3389 = vmatmul.mubr.msk.f32.vlgmr.msra.gmra.mrb[36].mxu0 %vm435_vm2, %v2454_v59  ;;  %3394 = vmatmul.mubr.msk.f32.vlgmr.msra.gmra.mrb[24].mxu1 %vm274_vm1, %v2619_v1 }
 0xbcf   :  { %3397 = vmatpush3.xpose.msk.msra.mxu0 %vm274_vm1, %v2699_v34  ;;  %3398 = vmatprep.mubr.msk.f32.mxu0 %vm3725_vm0, %v3724_v0  ;;  %v119_v34 = vld [vmem:[#allocation8 + $0x68] sm:$0xff] }
 0xbd0   :  { %3406 = vmatprep.subr.mxu0 %v3724_v0  ;;  %3403 = vmatprep.mubr.msk.f32.mxu1 %vm3725_vm0, %v3724_v0  ;;  %v3534_v35 = vpack.c.bf16 %v119_v34, %v118_v33 }
 0xbd2   :  { %3399 = vmatmul.mubr.msk.f32.vlgmr.msra.gmra.mrb[38].mxu0 %vm274_vm1, %v2697_v40 }
 0xbd3   :  { %3408 = vmatprep.mubr.msk.f32.mxu0 %vm3725_vm0, %v3724_v0 }
 0xc9d   :  { %v2527_v42 = vpop.f32.mrb[22].mxu1 }
 0xc9e   :  { %v3385_v45 = vpop.f32.mrb[23].mxu1 }
 0xca1   :  { %v2603_v47 = vpop.f32.mrb[36].mxu0  ;;  %v2692_v48 = vpop.f32.mrb[24].mxu1 }
 0xca2   :  { %v3112_v49 = vclamps-f32 %v2692_v48, 5.0  ;;  %v3390_v50 = vpop.f32.mrb[37].mxu0  ;;  %v3395_v51 = vpop.f32.mrb[25].mxu1 }
 0xca4   :  { %v2778_v52 = vmul.f32 1.442695, %v3112_v49 }
 0xca5   :  { %v2770_v53 = vpop.f32.mrb[38].mxu0 }
 0xca6   :  { %3615 = vpow2.f32 %v2778_v52  ;;  %v3113_v54 = vclamps-f32 %v2770_v53, 5.0  ;;  %v3400_v55 = vpop.f32.mrb[39].mxu0 }
 0xca8   :  { %v2780_v56 = vmul.f32 1.442695, %v3113_v54 }
 0xcaa   :  { %3617 = vpow2.f32 %v2780_v56 }
 0xcb0   :  { %v3616_v57 = vpop.eup %3615 }
 0xcb1   :  { %v2782_v58 = vsel %vm435_vm2, %v3616_v57, 0.0 }
 0xcb2   :  { %2783 = vadd.xlane.f32.xlu1 %v2782_v58 }
 0xcb4   :  { %v3618_v61 = vpop.eup %3617 }
 0xcb5   :  { %v2785_v0 = vsel %vm435_vm2, %v3618_v61, 0.0 }
 0xcb6   :  { %2786 = vadd.xlane.f32.xlu0 %v2785_v0 }
 0xcc3   :  { %2868 = vrot.lane.b32.xlu1 %v3834_v28, %s3732_s28 }
 0xcc7   :  { %924 = vrot.lane.b32.xlu1 %v3904_v11, %s3732_s28 }
 0xccb   :  { %1261 = vrot.lane.b32.xlu1 %v3940_v41, %s3731_s27 }
 0xccc   :  { %2792 = vrot.lane.b32.xlu0 %v3836_v29, %s3732_s28 }
 0xccf   :  { %1598 = vrot.lane.b32.xlu1 %v3976_v10, %s3730_s26 }
 0xcd0   :  { %926 = vrot.lane.b32.xlu0 %v3906_v13, %s3732_s28 }
 0xcd3   :  { %1935 = vrot.lane.b32.xlu1 %v4012_v44, %s3729_s25 }
 0xcd4   :  { %1263 = vrot.lane.b32.xlu0 %v3942_v43, %s3731_s27 }
 0xcd7   :  { %2272 = vrot.lane.b32.xlu1 %v4048_v15, %s3728_s24  ;;  %v108_v15 = vld [vmem:[#allocation8 + $0x10] sm:$0xff] }
 0xcd8   :  { %1600 = vrot.lane.b32.xlu0 %v3978_v14, %s3730_s26 }
 0xcdb   :  { %2609 = vrot.lane.b32.xlu1 %v2527_v42, %s3727_s23 }
 0xcdc   :  { %1937 = vrot.lane.b32.xlu0 %v4014_v46, %s3729_s25 }
 0xce0   :  { %2274 = vrot.lane.b32.xlu0 %v4050_v17, %s3728_s24  ;;  %v109_v17 = vld [vmem:[#allocation8 + $0x18] sm:$0xff] }
 0xce1   :  { %v3514_v18 = vpack.c.bf16 %v109_v17, %v108_v15 }
 0xce4   :  { %2611 = vrot.lane.b32.xlu0 %v2603_v47, %s3727_s23 }
 0xd3f   :  { %v2784_v28 = vpop.xlane.xlu1 %2783 }
 0xd40   :  { %3619 = vrcp.f32 %v2784_v28 }
 0xd43   :  { %v2869_v29 = vpop.permute.xlu1 %2868  ;;  %v2787_v11 = vpop.xlane.xlu0 %2786 }
 0xd44   :  { %3621 = vrcp.f32 %v2787_v11  ;;  %3407 = vmatpush3.msra.mxu0 %v2869_v29 }
 0xd47   :  { %v925_v13 = vpop.permute.xlu1 %924  ;;  %v2793_v41 = vpop.permute.xlu0 %2792 }
 0xd48   :  { %931 = vst.msk [vmem:[#allocation2] sm:$0xff] %vm930_vm3, %v925_v13  ;;  %3402 = vmatpush3.msra.mxu1 %v2793_v41 }
 0xd49   :  { %3511 = vmatprep.subr.bf16.mxu1 %v3510_v16 }
 0xd4a   :  { %v3620_v43 = vpop.eup %3619 }
 0xd4b   :  { %v2790_v10 = vmul.f32 %v3620_v43, %v3616_v57  ;;  %v1262_v14 = vpop.permute.xlu1 %1261  ;;  %v927_v44 = vpop.permute.xlu0 %926 }
 0xd4c   :  { %1268 = vst.msk [vmem:[#allocation2] sm:$0xff] %vm1267_vm4, %v1262_v14 }
 0xd4d   :  { %932 = vst.msk [vmem:[#allocation2 + $0x8] sm:$0xff] %vm930_vm3, %v927_v44  ;;  %3404 = vmatmul.mubr.msk.f32.vlgmr.msra.gmra.mrb[26].mxu1 %vm435_vm2, %v2790_v10 }
 0xd4e   :  { %v3622_v46 = vpop.eup %3621  ;;  %3513 = vmatpush3.bf16.msra.mxu1 %v3510_v16 }
 0xd4f   :  { %v2791_v62 = vmul.f32 %v3622_v46, %v3618_v61  ;;  %v1599_v63 = vpop.permute.xlu1 %1598  ;;  %v1264_v3 = vpop.permute.xlu0 %1263  ;;  %3515 = vmatprep.subr.bf16.mxu1 %v3514_v18 }
 0xd50   :  { %1605 = vst.msk [vmem:[#allocation2] sm:$0xff] %vm1604_vm5, %v1599_v63 }
 0xd51   :  { %1269 = vst.msk [vmem:[#allocation2 + $0x8] sm:$0xff] %vm1267_vm4, %v1264_v3  ;;  %3409 = vmatmul.mubr.msk.f32.vlgmr.msra.gmra.mrb[40].mxu0 %vm435_vm2, %v2791_v62 }
 0xd52   :  { %3517 = vmatpush3.bf16.msra.mxu1 %v3514_v18 }
 0xd53   :  { %v1936_v4 = vpop.permute.xlu1 %1935  ;;  %v1601_v5 = vpop.permute.xlu0 %1600  ;;  %3519 = vmatprep.subr.bf16.mxu1 %v3518_v21 }
 0xd54   :  { %1942 = vst.msk [vmem:[#allocation2] sm:$0xff] %vm1941_vm6, %v1936_v4 }
 0xd55   :  { %1606 = vst.msk [vmem:[#allocation2 + $0x8] sm:$0xff] %vm1604_vm5, %v1601_v5 }
 0xd56   :  { %3521 = vmatpush3.bf16.msra.mxu1 %v3518_v21 }
 0xd57   :  { %v2273_v6 = vpop.permute.xlu1 %2272  ;;  %v1938_v7 = vpop.permute.xlu0 %1937  ;;  %3523 = vmatprep.subr.bf16.mxu1 %v3522_v24 }
 0xd58   :  { %2279 = vst.msk [vmem:[#allocation2] sm:$0xff] %vm2278_vm7, %v2273_v6 }
 0xd59   :  { %1943 = vst.msk [vmem:[#allocation2 + $0x8] sm:$0xff] %vm1941_vm6, %v1938_v7 }
 0xd5a   :  { %3525 = vmatpush3.bf16.msra.mxu1 %v3522_v24 }
 0xd5b   :  { %v2610_v60 = vpop.permute.xlu1 %2609  ;;  %v2275_v8 = vpop.permute.xlu0 %2274  ;;  %3527 = vmatprep.subr.bf16.mxu1 %v3526_v27 }
 0xd5c   :  { %2616 = vst.msk [vmem:[#allocation2] sm:$0xff] %vm2615_vm8, %v2610_v60 }
 0xd5d   :  { %2280 = vst.msk [vmem:[#allocation2 + $0x8] sm:$0xff] %vm2278_vm7, %v2275_v8 }
 0xd5e   :  { %3529 = vmatpush3.bf16.msra.mxu1 %v3526_v27 }
 0xd5f   :  { %v2612_v9 = vpop.permute.xlu0 %2611  ;;  %3531 = vmatprep.subr.bf16.mxu1 %v3530_v32 }
 0xd60   :  { %2617 = vst.msk [vmem:[#allocation2 + $0x8] sm:$0xff] %vm2615_vm8, %v2612_v9 }
 0xd62   :  { %3533 = vmatpush3.bf16.msra.mxu1 %v3530_v32 }
 0xd63   :  { %3535 = vmatprep.subr.bf16.mxu1 %v3534_v35 }
 0xd66   :  { %3537 = vmatpush3.bf16.msra.mxu1 %v3534_v35 }
 0xd67   :  { %3539 = vmatprep.subr.bf16.mxu1 %v3538_v38 }
 0xd6a   :  { %3541 = vmatpush3.bf16.msra.mxu1 %v3538_v38 }
 0xe20   :  { %v2864_v39 = vpop.f32.mrb[26].mxu1 }
 0xe21   :  { %2946 = vrot.lane.b32.xlu1 %v2864_v39, %s3726_s2  ;;  %v3405_v59 = vpop.f32.mrb[27].mxu1 }
 0xe24   :  { %v2940_v1 = vpop.f32.mrb[40].mxu0 }
 0xe25   :  { %2948 = vrot.lane.b32.xlu0 %v2940_v1, %s3726_s2  ;;  %v3410_v40 = vpop.f32.mrb[41].mxu0 }
 0xe93   :  { %v2947_v42 = vpop.permute.xlu1 %2946 }
 0xe94   :  { %2953 = vst.msk [vmem:[#allocation2] sm:$0xff] %vm2952_vm9, %v2947_v42 }
 0xe97   :  { %v2949_v45 = vpop.permute.xlu0 %2948 }
 0xe98   :  { %2954 = vst.msk [vmem:[#allocation2 + $0x8] sm:$0xff] %vm2952_vm9, %v2949_v45 }
 0xe9b   :  { %v2955_v47 = vld [vmem:[#allocation2] sm:$0xff] }
 0xe9c   :  { %3443 = vmatprep.mubr.f32.mxu1 %v2955_v47 }
 0xe9f   :  { %v2956_v48 = vld [vmem:[#allocation2 + $0x8] sm:$0xff] }
 0xea0   :  { %3444 = vmatmul.mubr.f32.vlgmr.msra.gmra.mrb[28].mxu1 %v2956_v48 }
 0xf73   :  { %v3445_v49 = vpop.f32.mrb[28].mxu1 }
 0xf74   :  { %3033 = vst [vmem:[#allocation9 + $0x8] sm:$0xff] %v3445_v49  ;;  %v3023_v50 = vpop.f32.mrb[29].mxu1 }
 0xf75   :  { %3032 = vst [vmem:[#allocation9] sm:$0xff] %v3023_v50 }
 0xf76   :  { %3700 = shalt.err (!%p3697_p0)
}
 0xf77   :  { %s3701_s7 = scalar_lea.hbm %s4124_s3, 256 }
 0xf78   :  { %p3702_p1 = scmp.ne.s32.totalorder %s4124_s3, %s3701_s7  ;;  %p3705_p2 = scmp.lt.u32.totalorder %s3701_s7, %s4124_s3 }
 0xf7a   :  { %p3707_p3 = pnand %p3705_p2, %p3702_p1 }
 0xf7c   :  { %3710 = shalt.err (!%p3707_p3)
}
 0xf7d   :  { %3045 = dma.vmem_to_hbm [thread:$0]  %s3040_s30, 256, %s4124_s3, [#allocation5], %s3721_s1, %s3721_s1, %s3722_s9  }
 0xf7e   :  { %3715 = dma.done.wait [#allocation5], 256  }
 0xf7f   :  { %3716 = vsyncadd [#allocation5], 4294967040 }
 0xf80   :  { %3049 = vsyncpa [#allocation4], 1 }
 0xf81   :  { %3050 = vsyncpa [#allocation7], 1 }
 0xf82   :  { %3051 = vsyncpa [#allocation5], 1 }

</bundles_post_ra>
